<compile_context>
chip_gen: v7x
topology: tpu7x:2x2x1
jax: 0.10.0
libtpu: 0.0.40
codegen_flags: <defaults>
</compile_context>

<pallas_src>
import functools

import jax
import jax.numpy as jnp
from jax.experimental import pallas as pl
from jax.experimental.pallas import tpu as pltpu


_TILE_CANDIDATES = (1024, 512, 256, 128)  # descending; 256-multiples preferred


def _round_up(x, m):
    return ((x + m - 1) // m) * m


def _pick_tile(dim):
    """Choose a K/N tile. Dims <= 512 get a single tile covering the (padded)
    dim; larger dims pick the >=256 candidate with least padding, preferring
    the larger tile on ties (per-step overhead beats modest pad waste).
    The dim is then padded UP to a multiple of the chosen tile."""
    if dim <= _TILE_CANDIDATES[1]:               # <= 512: one tile covers it
        for c in reversed(_TILE_CANDIDATES):     # 128, 256, 512, 1024
            if c >= dim:
                return c
    best_pad, best_c = None, None
    for c in _TILE_CANDIDATES[:-1]:              # 1024, 512, 256 (never 128 here)
        pad = _round_up(dim, c)
        if best_pad is None or pad < best_pad:
            best_pad, best_c = pad, c
    return best_c


def _divisor_tile(padded_dim):
    """Largest candidate dividing an already tile-padded dim."""
    for c in _TILE_CANDIDATES:
        if padded_dim % c == 0:
            return c
    return padded_dim


def _sublane_pack(dtype):
    """Rows per packed sublane group: 8 for f32, 16 for bf16, 32 for int8/fp8."""
    return max(8, 32 // jnp.dtype(dtype).itemsize)


def _vmem_capacity_bytes():
    try:
        return int(pltpu.get_tpu_info().vmem_capacity_bytes)
    except Exception:
        return 64 << 20  # conservative: v7x per-TC VMEM


def dense_kernel(x_ref, w_ref, b_ref, a_ref, o_ref, acc_ref):
    # x_ref: (TB, TK)  w_ref: (TK, TN)  b_ref: (1, TN)  a_ref: (1,) in SMEM
    # o_ref: (TB, TN)  acc_ref: (TB, TN) f32 scratch, resident across K steps.
    k = pl.program_id(2)

    @pl.when(k == 0)
    def _():
        # Initialize with the broadcast bias: removes the epilogue bias add.
        acc_ref[...] = jnp.broadcast_to(
            b_ref[...].astype(jnp.float32), acc_ref.shape
        )

    # MXU matmul, contraction on IN, f32 accumulation. Weight is pre-transposed
    # (IN, OUT) so no in-kernel transpose and the tile is lane-dense along OUT.
    acc_ref[...] += jnp.dot(
        x_ref[...], w_ref[...], preferred_element_type=jnp.float32
    )

    @pl.when(k == pl.num_programs(2) - 1)
    def _():
        y = acc_ref[...]
        alpha = a_ref[0]  # scalar read from SMEM
        o_ref[...] = jnp.where(y >= 0.0, y, alpha * y).astype(o_ref.dtype)


def prepare_dense_params(weight, bias):
    """One-time parameter prep (call at load time, NOT per forward):
    transpose the PyTorch-layout (OUT, IN) weight to (IN, OUT) and zero-pad
    weight/bias to tile multiples so no transpose/pad runs inside the step."""
    OUT, IN = weight.shape
    tile_k = _pick_tile(IN)
    tile_n = _pick_tile(OUT)
    IN_pad = _round_up(IN, tile_k)
    OUT_pad = _round_up(OUT, tile_n)
    wt_p = jnp.pad(weight.T, ((0, IN_pad - IN), (0, OUT_pad - OUT)))  # (IN_pad, OUT_pad)
    b_p = jnp.pad(bias.reshape(1, OUT), ((0, 0), (0, OUT_pad - OUT)))  # (1, OUT_pad)
    return wt_p, b_p


@functools.partial(jax.jit, static_argnames=("out_size", "max_tile_b"))
def dense_forward_prepared(x, wt_p, b_p, alpha, *, out_size, max_tile_b=1024):
    """x: (B, IN); wt_p: (IN_pad, OUT_pad) pre-transposed/padded; b_p: (1, OUT_pad)."""
    B, IN = x.shape
    IN_pad, OUT_pad = wt_p.shape
    assert IN <= IN_pad and out_size <= OUT_pad

    # Tiles from the (already tile-multiple) padded dims.
    tile_k = _divisor_tile(IN_pad)
    tile_n = _divisor_tile(OUT_pad)

    # Batch tile: dtype-aware sublane packing; cover all of B when it fits so
    # the weight is streamed from HBM exactly once (grid_i == 1).
    pack = _sublane_pack(x.dtype)
    tile_b = min(max_tile_b, _round_up(B, pack))
    B_pad = _round_up(B, tile_b)

    # Zero padding along IN contributes nothing to the contraction.
    x_p = jnp.pad(x, ((0, B_pad - B), (0, IN_pad - IN)))
    alpha_s = jnp.asarray(alpha, dtype=jnp.float32).reshape(1)  # SMEM scalar

    grid = (B_pad // tile_b, OUT_pad // tile_n, IN_pad // tile_k)

    # VMEM budget: double-buffered x/w/bias/out tiles + resident f32 acc + headroom,
    # capped at 75% of this generation's VMEM capacity (v7x: 64 MiB per TC).
    itm = x.dtype.itemsize
    per_step = (
        tile_b * tile_k * itm                      # x tile
        + tile_k * tile_n * wt_p.dtype.itemsize    # weight tile
        + tile_n * 4                               # bias tile
        + tile_b * tile_n * itm                    # output tile (also double-buffered)
    )
    vmem_need = 2 * per_step + tile_b * tile_n * 4 + (4 << 20)
    vmem_limit = int(min(max(vmem_need, 16 << 20),
                         int(0.75 * _vmem_capacity_bytes())))

    # NOTE(v7x): with grid_i == 1, the OUT axis (grid[1]) is the parallel axis
    # that feeds both TensorCores; it has >= 2 tiles whenever OUT_pad > tile_n.
    out = pl.pallas_call(
        dense_kernel,
        out_shape=jax.ShapeDtypeStruct((B_pad, OUT_pad), x.dtype),
        grid_spec=pltpu.PrefetchScalarGridSpec(
            num_scalar_prefetch=0,
            grid=grid,
            in_specs=[
                pl.BlockSpec((tile_b, tile_k), lambda i, j, k: (i, k)),  # x
                pl.BlockSpec((tile_k, tile_n), lambda i, j, k: (k, j)),  # W^T (IN,OUT)
                pl.BlockSpec((1, tile_n), lambda i, j, k: (0, j)),       # bias
                pl.BlockSpec(memory_space=pltpu.SMEM),                   # alpha scalar
            ],
            out_specs=pl.BlockSpec((tile_b, tile_n), lambda i, j, k: (i, j)),
            scratch_shapes=[pltpu.VMEM((tile_b, tile_n), jnp.float32)],
        ),
        compiler_params=pltpu.CompilerParams(
            dimension_semantics=("parallel", "parallel", "arbitrary"),
            vmem_limit_bytes=vmem_limit,
        ),
    )(x_p, wt_p, b_p, alpha_s)

    return out[:B, :out_size]


def dense_forward(x, weight, bias, alpha):
    """Full Dense forward: dropout (eval-mode identity) -> linear -> PReLU.

    Sub-tile problems (everything fits a single <=128^3 MXU tile) take a plain
    XLA fast path; otherwise the weight is prepared once and the Pallas kernel
    is used. For repeated calls with the same weights, call
    prepare_dense_params() once and use dense_forward_prepared() directly."""
    B, IN = x.shape
    OUT = weight.shape[0]
    if _round_up(B, _sublane_pack(x.dtype)) <= 128 and IN <= 128 and OUT <= 128:
        y = x @ weight.T + bias
        return jnp.where(y >= 0, y, alpha * y).astype(x.dtype)
    wt_p, b_p = prepare_dense_params(weight, bias)
    return dense_forward_prepared(x, wt_p, b_p, alpha, out_size=OUT)


if __name__ == "__main__":
    key = jax.random.PRNGKey(0)
    k1, k2, k3, k4, k5, k6 = jax.random.split(key, 6)
    alpha = jnp.float32(0.25)  # nn.PReLU default init

    # ---- Case 1: the module's own small shapes (B=8, in=32, out=16) -> XLA fast path.
    B1, IN1, OUT1 = 8, 32, 16
    bound1 = 1.0 / (IN1 ** 0.5)
    x1 = jax.random.normal(k1, (B1, IN1), dtype=jnp.float32)
    w1 = jax.random.uniform(k2, (OUT1, IN1), jnp.float32, minval=-bound1, maxval=bound1)
    b1 = jax.random.uniform(k3, (OUT1,), jnp.float32, minval=-bound1, maxval=bound1)

    y1 = jax.block_until_ready(dense_forward(x1, w1, b1, alpha))
    ref1 = x1 @ w1.T + b1
    ref1 = jnp.where(ref1 >= 0, ref1, alpha * ref1)
    assert y1.shape == (B1, OUT1)
    assert jnp.allclose(y1, ref1, atol=1e-5, rtol=1e-5), "fast-path mismatch"

    # ---- Case 2: a larger ragged shape exercising the Pallas kernel path:
    # 256-aligned K/N tiles with zero padding, multi-step K reduction, multi-tile
    # OUT axis, bias-initialized accumulator, lane-dense output block.
    B2, IN2, OUT2 = 200, 640, 600
    bound2 = 1.0 / (IN2 ** 0.5)
    x2 = jax.random.normal(k4, (B2, IN2), dtype=jnp.float32)
    w2 = jax.random.uniform(k5, (OUT2, IN2), jnp.float32, minval=-bound2, maxval=bound2)
    b2 = jax.random.uniform(k6, (OUT2,), jnp.float32, minval=-bound2, maxval=bound2)

    wt_p, b_p = prepare_dense_params(w2, b2)  # one-time, outside the per-step jit
    y2 = jax.block_until_ready(
        dense_forward_prepared(x2, wt_p, b_p, alpha, out_size=OUT2)
    )
    ref2 = jnp.dot(x2, w2.T, precision=jax.lax.Precision.HIGHEST) + b2
    ref2 = jnp.where(ref2 >= 0, ref2, alpha * ref2)
    assert y2.shape == (B2, OUT2)
    assert jnp.allclose(y2, ref2, atol=1e-3, rtol=1e-3), "kernel mismatch vs reference"

    print("KERNEL_OK")
</pallas_src>

<mosaic_0001>
module attributes {stable_mosaic.version = 11 : i64} {
  func.func @dense_kernel(%arg0: i32, %arg1: i32, %arg2: i32, %arg3: memref<200x256xf32, #tpu.memory_space<vmem>>, %arg4: memref<256x256xf32, #tpu.memory_space<vmem>>, %arg5: memref<1x256xf32, #tpu.memory_space<vmem>>, %arg6: memref<1xf32, #tpu.memory_space<smem>>, %arg7: memref<200x256xf32, #tpu.memory_space<vmem>>, %arg8: memref<200x256xf32, #tpu.memory_space<vmem>>) attributes {dimension_semantics = [#tpu.dimension_semantics<parallel>, #tpu.dimension_semantics<parallel>, #tpu.dimension_semantics<arbitrary>], iteration_bounds = array<i64: 1, 3, 3>, scalar_prefetch = 0 : i64, scratch_operands = 1 : i64, tpu.core_type = #tpu.core_type<tc>, window_params = [{transform_indices = @transform_0, window_bounds = array<i64: 200, 256>}, {transform_indices = @transform_1, window_bounds = array<i64: 256, 256>}, {transform_indices = @transform_2, window_bounds = array<i64: 1, 256>}, {transform_indices = @transform_3, window_bounds = array<i64: 1>}, {transform_indices = @transform_4, window_bounds = array<i64: 200, 256>}]} {
    %c0_i32 = arith.constant 0 : i32
    %0 = arith.cmpi eq, %arg2, %c0_i32 : i32
    %1 = arith.extui %0 : i1 to i32
    %c0_i32_0 = arith.constant 0 : i32
    %2 = arith.cmpi ne, %1, %c0_i32_0 : i32
    scf.if %2 {
      %c0_9 = arith.constant 0 : index
      %c0_10 = arith.constant 0 : index
      %12 = vector.load %arg5[%c0_9, %c0_10] : memref<1x256xf32, #tpu.memory_space<vmem>>, vector<1x256xf32>
      %13 = vector.shape_cast %12 : vector<1x256xf32> to vector<1x256xf32>
      %14 = vector.broadcast %13 : vector<1x256xf32> to vector<200x256xf32>
      %c0_11 = arith.constant 0 : index
      %c0_12 = arith.constant 0 : index
      %15 = vector.load %arg8[%c0_11, %c0_12] : memref<200x256xf32, #tpu.memory_space<vmem>>, vector<200x256xf32>
      tpu.vector_store %arg8[%c0_11, %c0_12], %14 {strides = array<i32>} : memref<200x256xf32, #tpu.memory_space<vmem>>, vector<200x256xf32>,
    } else {
    }
    %c0 = arith.constant 0 : index
    %c0_1 = arith.constant 0 : index
    %3 = vector.load %arg8[%c0, %c0_1] : memref<200x256xf32, #tpu.memory_space<vmem>>, vector<200x256xf32>
    %c0_2 = arith.constant 0 : index
    %c0_3 = arith.constant 0 : index
    %4 = vector.load %arg3[%c0_2, %c0_3] : memref<200x256xf32, #tpu.memory_space<vmem>>, vector<200x256xf32>
    %c0_4 = arith.constant 0 : index
    %c0_5 = arith.constant 0 : index
    %5 = vector.load %arg4[%c0_4, %c0_5] : memref<256x256xf32, #tpu.memory_space<vmem>>, vector<256x256xf32>
    %cst = arith.constant dense<0.000000e+00> : vector<200x256xf32>
    %6 = tpu.matmul %4, %5, %cst {dimension_numbers = #tpu.dot_dimension_numbers<[1], [0], [0], [1], [0, 0, 1, 1], [], []>} : vector<200x256xf32>, vector<256x256xf32>, vector<200x256xf32> -> vector<200x256xf32>
    %7 = arith.addf %3, %6 : vector<200x256xf32>
    %c0_6 = arith.constant 0 : index
    %c0_7 = arith.constant 0 : index
    %8 = vector.load %arg8[%c0_6, %c0_7] : memref<200x256xf32, #tpu.memory_space<vmem>>, vector<200x256xf32>
    tpu.vector_store %arg8[%c0_6, %c0_7], %7 {strides = array<i32>} : memref<200x256xf32, #tpu.memory_space<vmem>>, vector<200x256xf32>,
    %c2_i32 = arith.constant 2 : i32
    %9 = arith.cmpi eq, %arg2, %c2_i32 : i32
    %10 = arith.extui %9 : i1 to i32
    %c0_i32_8 = arith.constant 0 : i32
    %11 = arith.cmpi ne, %10, %c0_i32_8 : i32
    scf.if %11 {
      %c0_9 = arith.constant 0 : index
      %c0_10 = arith.constant 0 : index
      %12 = vector.load %arg8[%c0_9, %c0_10] : memref<200x256xf32, #tpu.memory_space<vmem>>, vector<200x256xf32>
      %c0_11 = arith.constant 0 : index
      %13 = memref.load %arg6[%c0_11] : memref<1xf32, #tpu.memory_space<smem>>
      %cst_12 = arith.constant 0.000000e+00 : f32
      %14 = vector.broadcast %cst_12 : f32 to vector<200x256xf32>
      %15 = arith.cmpf oge, %12, %14 : vector<200x256xf32>
      %16 = vector.broadcast %13 : f32 to vector<200x256xf32>
      %17 = arith.mulf %16, %12 : vector<200x256xf32>
      %18 = arith.select %15, %12, %17 : vector<200x256xi1>, vector<200x256xf32>
      %c0_13 = arith.constant 0 : index
      %c0_14 = arith.constant 0 : index
      %19 = vector.load %arg7[%c0_13, %c0_14] : memref<200x256xf32, #tpu.memory_space<vmem>>, vector<200x256xf32>
      tpu.vector_store %arg7[%c0_13, %c0_14], %18 {strides = array<i32>} : memref<200x256xf32, #tpu.memory_space<vmem>>, vector<200x256xf32>,
    } else {
    }
    return
  }
  func.func @transform_0(%arg0: i32, %arg1: i32, %arg2: i32) -> (i32, i32) {
    %c0_i32 = arith.constant 0 : i32
    return %arg0, %arg2 : i32, i32
  }
  func.func @transform_1(%arg0: i32, %arg1: i32, %arg2: i32) -> (i32, i32) {
    %c0_i32 = arith.constant 0 : i32
    return %arg2, %arg1 : i32, i32
  }
  func.func @transform_2(%arg0: i32, %arg1: i32, %arg2: i32) -> (i32, i32) {
    %c0_i32 = arith.constant 0 : i32
    %c0_i32_0 = arith.constant 0 : i32
    return %c0_i32, %arg1 : i32, i32
  }
  func.func @transform_3(%arg0: i32, %arg1: i32, %arg2: i32) -> i32 {
    %c0_i32 = arith.constant 0 : i32
    %c0_i32_0 = arith.constant 0 : i32
    return %c0_i32 : i32
  }
  func.func @transform_4(%arg0: i32, %arg1: i32, %arg2: i32) -> (i32, i32) {
    %c0_i32 = arith.constant 0 : i32
    return %arg0, %arg1 : i32, i32
  }
}

</mosaic_0001>

<bundles_post_ra>
// kernel: dense_forward_prepared.1
= control target key start
LH: loop header
LB: loop body
LE: loop exit
PB: predicated region body
PF: predicated region fallthrough
CT: control target
= control target key end

     0   :  { %s2658_s0 = inlined_call_operand.vmem [shape: f32[200,768], index: 0, kind: input, shape index: {}]   ;;  %s2659_s1 = inlined_call_operand.hbm [shape: f32[768,768], index: 1, kind: input, shape index: {}]   ;;  %s2660_s2 = inlined_call_operand.hbm [shape: f32[1,768], index: 2, kind: input, shape index: {}]   ;;  %s2661_s3 = inlined_call_operand.<no memory space> [shape: f32[1], index: 3, kind: input, shape index: {}]   ;;  %s2662_s4 = inlined_call_operand.vmem [shape: f32[200,768], index: 4, kind: output, shape index: {}]  }
   0x1   :  { %2670 = sst [smem:[#allocation20_spill]] %s2658_s0 }
   0x2   :  { %2671 = sst [smem:[#allocation21_spill]] %s2659_s1 }
   0x3   :  { %9 = sst [smem:[#allocation3]] %s2661_s3 }
   0x4   :  { %10 = vsyncpa [#allocation6], 0 }
   0x5   :  { %12 = vsyncpa [#allocation6 + $0x1], 0 }
   0x6   :  { %13 = vsyncpa [#allocation8], 0 }
   0x7   :  { %15 = vsyncpa [#allocation8 + $0x1], 0  ;;  %s1920_s17 = smov 0   ;;  %s1922_s18 = smov 0  }
   0x8   :  { %s1924_s19 = smov 0   ;;  %s1926_s20 = smov 0  }
   0x9   :  { %s1928_s21 = smov 0   ;;  %s1930_s22 = smov 0  }
   0xa   :  { %s1932_s23 = smov 0   ;;  %s1934_s24 = smov 0  }
   0xb   :  { %s1936_s3 = smov 0   ;;  %s1938_s25 = smov 0  }
   0xc   :  { %s1940_s26 = smov 0   ;;  %s1942_s27 = smov 0  }
   0xd   :  { %s1944_s28 = smov 0  }
   0xe LB: > { %2672 = sst [smem:[#allocation12_spill]] %s1857_s22  ;;  %s1482_s29 = sadd.s32 4294967295, %s1885_s28   ;;  %s1885_s28 = sphi %s1944_s28, %s21_s28   ;;  %s1881_s27 = sphi %s1942_s27, %s2709_s27   ;;  %s1877_s26 = sphi %s1940_s26, %s2700_s26   ;;  %s1873_s25 = sphi %s1938_s25, %s2708_s25   ;;  %s1869_s3 = sphi %s1936_s3, %s2699_s3   ;;  %s1865_s24 = sphi %s1934_s24, %s2698_s24   ;;  %s1861_s23 = sphi %s1932_s23, %s2697_s23   ;;  %s1857_s22 = sphi %s1930_s22, %s2696_s22   ;;  %s1853_s21 = sphi %s1928_s21, %s2707_s21   ;;  %s1849_s20 = sphi %s1926_s20, %s2706_s20   ;;  %s1845_s19 = sphi %s1924_s19, %s2705_s19   ;;  %s1841_s18 = sphi %s1922_s18, %s2704_s18   ;;  %s1837_s17 = sphi %s1920_s17, %s2703_s17  }
   0xf   : > { %2673 = sst [smem:[#allocation13_spill]] %s1865_s24  ;;  %s33_s30 = sadd.s32 1, %s1877_s26 }
  0x10   : > { %2674 = sst [smem:[#allocation14_spill]] %s1877_s26  ;;  %p34_p0 = scmp.ge.s32.totalorder %s33_s30, 3 }
  0x11   : > { %s36_s5 = sadd.s32 1, %s1881_s27  ;;  %s49_s6 = sadd.s32 1, %s1865_s24 }
  0x12   : > { %p56_p1 = scmp.ne.s32.totalorder %s1865_s24, %s1861_s23  ;;  %s2711_s30 = smov (%p34_p0, %s33_s30), 0 }
  0x13   : > { %2675 = sst [smem:[#allocation15_spill]] %s2711_s30  ;;  %s2713_s5 = smov (!%p34_p0, %s36_s5), %s1881_s27 }
  0x14   : > { %s45_s7 = ssub.s32 %s1877_s26, %s2711_s30  ;;  %p57_p2 = scmp.eq.s32.totalorder %s1885_s28, 0 }
  0x15   : > { %p38_p3 = scmp.ge.s32.totalorder %s2713_s5, 3  ;;  %p47_p4 = scmp.eq.s32.totalorder %s45_s7, 0 }
  0x16   : > { %p1999_p5 = por %p57_p2, %p56_p1  ;;  %s77_s9 = sadd.s32 1, %s1857_s22 }
  0x17   : > { %s2715_s5 = smov (%p38_p3, %s2713_s5), 0  ;;  %p84_p6 = scmp.ne.s32.totalorder %s1857_s22, %s1853_s21 }
  0x18   : > { %2677 = sst [smem:[#allocation16_spill]] %s2715_s5  ;;  %s73_s11 = ssub.s32 %s1881_s27, %s2715_s5 }
  0x19   : > { %s2007_s10 = scalar_select %p47_p4, %s1865_s24, %s49_s6  }
  0x1a   : > { %s74_s12 = sor.u32 %s73_s11, %s45_s7  ;;  %p90_p7 = scmp.ne.s32.totalorder %s1853_s21, %s1849_s20 }
  0x1b   : > { %2678 = sst [smem:[#allocation17_spill]] %s2007_s10  ;;  %p75_p8 = scmp.eq.s32.totalorder %s74_s12, 0 }
  0x1c   : > { %p2017_p9 = por %p84_p6, %p57_p2  ;;  %p91_p10 = scmp.eq.s32.totalorder %s1482_s29, 0 }
  0x1d   : > { %p101_p11 = scmp.eq.s32.totalorder %s73_s11, 0  ;;  %s103_s16 = sadd.s32 1, %s1845_s19 }
  0x1e   : > { %s2024_s14 = scalar_select %p75_p8, %s1857_s22, %s77_s9  }
  0x1f   : > { %p2026_p12 = por %p91_p10, %p90_p7  ;;  %p110_p13 = scmp.ne.s32.totalorder %s1845_s19, %s1841_s18 }
  0x20   : > { %2680 = sst [smem:[#allocation18_spill]] %s2024_s14  ;;  %p116_p0 = scmp.ne.s32.totalorder %s1841_s18, %s1837_s17 }
  0x21   : > { %s2681_s15 = scalar_select %p2026_p12, 1, 0 }
  0x22   : > { %s2032_s6 = scalar_select %p101_p11, %s1845_s19, %s103_s16  }
  0x23   : > { %p163_p1 = scmp.eq.s32.totalorder %s1482_s29, 8  ;;  %p2042_p3 = por %p110_p13, %p57_p2 }
  0x24   : > { %2682 = sst [smem:[#allocation19_spill]] %s2032_s6  ;;  %p2046_p4 = por %p116_p0, %p91_p10 }
  0x25   : > { %p2050_p6 = por %p163_p1, %p110_p13  ;;  %p1485_p7 = scmp.ge.s32.totalorder %s1885_s28, 9 }
  0x26   : > { %s2684_s7 = scalar_select %p2046_p4, 1, 0 }
  0x27   : > { %s2685_s9 = scalar_select %p2050_p6, 1, 0 }
  0x28   : > { %188 = sbr.rel (%p1485_p7) target bundleno = 140 (0x8c), region = 20 }
  0x2f   : > { %191 = sbr.rel (!%p1999_p5) target bundleno = 83 (0x53), region = 24  ;;  %s193_s17 = sand.u32 (%p1999_p5), 1, %s1865_s24  }
  0x30   : > { %s1505_s29 = sshll.u32 (%p1999_p5), %s1877_s26, 4  ;;  %s1604_s11 = smul.u32 (%p1999_p5), 400, %s193_s17 }
  0x31   : > { %s2686_s0 = sld [smem:[#allocation20_spill]] (%p1999_p5) }
  0x32   : > { %s2070_s8 = scalar_lea.vmem (%p1999_p5), [#allocation4], %s1604_s11 }
  0x37   : > { %s2062_s5 = scalar_lea.vmem %s2686_s0, %s1505_s29 }
  0x38   : > { %v214_v0 = vld [vmem:[%s2062_s5] sm:$0xff]  ;;  %v216_v1 = vld [vmem:[%s2062_s5 + $0x8] sm:$0xff]  ;;  %v218_v2 = vld [vmem:[%s2062_s5 + $0x30] sm:$0xff] }
  0x39   : > { %v220_v3 = vld [vmem:[%s2062_s5 + $0x38] sm:$0xff]  ;;  %v222_v4 = vld [vmem:[%s2062_s5 + $0x60] sm:$0xff]  ;;  %v224_v5 = vld [vmem:[%s2062_s5 + $0x68] sm:$0xff]  ;;  %215 = vst [vmem:[%s2070_s8] sm:$0xff] %v214_v0 }
  0x3a   : > { %217 = vst [vmem:[%s2070_s8 + $0x8] sm:$0xff] %v216_v1  ;;  %219 = vst [vmem:[%s2070_s8 + $0x10] sm:$0xff] %v218_v2  ;;  %v226_v6 = vld [vmem:[%s2062_s5 + $0x90] sm:$0xff]  ;;  %v228_v7 = vld [vmem:[%s2062_s5 + $0x98] sm:$0xff] }
  0x3b   : > { %221 = vst [vmem:[%s2070_s8 + $0x18] sm:$0xff] %v220_v3  ;;  %223 = vst [vmem:[%s2070_s8 + $0x20] sm:$0xff] %v222_v4  ;;  %v230_v8 = vld [vmem:[%s2062_s5 + $0xc0] sm:$0xff]  ;;  %v232_v9 = vld [vmem:[%s2062_s5 + $0xc8] sm:$0xff] }
  0x3c   : > { %225 = vst [vmem:[%s2070_s8 + $0x28] sm:$0xff] %v224_v5  ;;  %227 = vst [vmem:[%s2070_s8 + $0x30] sm:$0xff] %v226_v6  ;;  %v234_v10 = vld [vmem:[%s2062_s5 + $0xf0] sm:$0xff]  ;;  %v236_v11 = vld [vmem:[%s2062_s5 + $0xf8] sm:$0xff] }
  0x3d   : > { %229 = vst [vmem:[%s2070_s8 + $0x38] sm:$0xff] %v228_v7  ;;  %231 = vst [vmem:[%s2070_s8 + $0x40] sm:$0xff] %v230_v8  ;;  %v238_v12 = vld [vmem:[%s2062_s5 + $0x120] sm:$0xff]  ;;  %v240_v13 = vld [vmem:[%s2062_s5 + $0x128] sm:$0xff] }
  0x3e   : > { %233 = vst [vmem:[%s2070_s8 + $0x48] sm:$0xff] %v232_v9  ;;  %235 = vst [vmem:[%s2070_s8 + $0x50] sm:$0xff] %v234_v10  ;;  %v242_v14 = vld [vmem:[%s2062_s5 + $0x150] sm:$0xff]  ;;  %v244_v15 = vld [vmem:[%s2062_s5 + $0x158] sm:$0xff] }
  0x3f   : > { %237 = vst [vmem:[%s2070_s8 + $0x58] sm:$0xff] %v236_v11  ;;  %239 = vst [vmem:[%s2070_s8 + $0x60] sm:$0xff] %v238_v12  ;;  %v246_v16 = vld [vmem:[%s2062_s5 + $0x180] sm:$0xff]  ;;  %v248_v17 = vld [vmem:[%s2062_s5 + $0x188] sm:$0xff] }
  0x40   : > { %241 = vst [vmem:[%s2070_s8 + $0x68] sm:$0xff] %v240_v13  ;;  %243 = vst [vmem:[%s2070_s8 + $0x70] sm:$0xff] %v242_v14  ;;  %v250_v18 = vld [vmem:[%s2062_s5 + $0x1b0] sm:$0xff]  ;;  %v252_v19 = vld [vmem:[%s2062_s5 + $0x1b8] sm:$0xff] }
  0x41   : > { %245 = vst [vmem:[%s2070_s8 + $0x78] sm:$0xff] %v244_v15  ;;  %247 = vst [vmem:[%s2070_s8 + $0x80] sm:$0xff] %v246_v16  ;;  %v254_v20 = vld [vmem:[%s2062_s5 + $0x1e0] sm:$0xff]  ;;  %v256_v21 = vld [vmem:[%s2062_s5 + $0x1e8] sm:$0xff] }
  0x42   : > { %249 = vst [vmem:[%s2070_s8 + $0x88] sm:$0xff] %v248_v17  ;;  %251 = vst [vmem:[%s2070_s8 + $0x90] sm:$0xff] %v250_v18  ;;  %v258_v22 = vld [vmem:[%s2062_s5 + $0x210] sm:$0xff]  ;;  %v260_v23 = vld [vmem:[%s2062_s5 + $0x218] sm:$0xff] }
  0x43   : > { %253 = vst [vmem:[%s2070_s8 + $0x98] sm:$0xff] %v252_v19  ;;  %255 = vst [vmem:[%s2070_s8 + $0xa0] sm:$0xff] %v254_v20  ;;  %v262_v24 = vld [vmem:[%s2062_s5 + $0x240] sm:$0xff]  ;;  %v264_v25 = vld [vmem:[%s2062_s5 + $0x248] sm:$0xff] }
  0x44   : > { %257 = vst [vmem:[%s2070_s8 + $0xa8] sm:$0xff] %v256_v21  ;;  %259 = vst [vmem:[%s2070_s8 + $0xb0] sm:$0xff] %v258_v22  ;;  %v266_v26 = vld [vmem:[%s2062_s5 + $0x270] sm:$0xff]  ;;  %v268_v27 = vld [vmem:[%s2062_s5 + $0x278] sm:$0xff] }
  0x45   : > { %261 = vst [vmem:[%s2070_s8 + $0xb8] sm:$0xff] %v260_v23  ;;  %263 = vst [vmem:[%s2070_s8 + $0xc0] sm:$0xff] %v262_v24  ;;  %v270_v28 = vld [vmem:[%s2062_s5 + $0x2a0] sm:$0xff]  ;;  %v272_v29 = vld [vmem:[%s2062_s5 + $0x2a8] sm:$0xff] }
  0x46   : > { %265 = vst [vmem:[%s2070_s8 + $0xc8] sm:$0xff] %v264_v25  ;;  %267 = vst [vmem:[%s2070_s8 + $0xd0] sm:$0xff] %v266_v26  ;;  %v274_v30 = vld [vmem:[%s2062_s5 + $0x2d0] sm:$0xff]  ;;  %v276_v31 = vld [vmem:[%s2062_s5 + $0x2d8] sm:$0xff] }
  0x47   : > { %269 = vst [vmem:[%s2070_s8 + $0xd8] sm:$0xff] %v268_v27  ;;  %271 = vst [vmem:[%s2070_s8 + $0xe0] sm:$0xff] %v270_v28  ;;  %v278_v32 = vld [vmem:[%s2062_s5 + $0x300] sm:$0xff]  ;;  %v280_v33 = vld [vmem:[%s2062_s5 + $0x308] sm:$0xff] }
  0x48   : > { %273 = vst [vmem:[%s2070_s8 + $0xe8] sm:$0xff] %v272_v29  ;;  %275 = vst [vmem:[%s2070_s8 + $0xf0] sm:$0xff] %v274_v30  ;;  %v282_v34 = vld [vmem:[%s2062_s5 + $0x330] sm:$0xff]  ;;  %v284_v35 = vld [vmem:[%s2062_s5 + $0x338] sm:$0xff] }
  0x49   : > { %277 = vst [vmem:[%s2070_s8 + $0xf8] sm:$0xff] %v276_v31  ;;  %279 = vst [vmem:[%s2070_s8 + $0x100] sm:$0xff] %v278_v32  ;;  %v286_v36 = vld [vmem:[%s2062_s5 + $0x360] sm:$0xff]  ;;  %v288_v37 = vld [vmem:[%s2062_s5 + $0x368] sm:$0xff] }
  0x4a   : > { %281 = vst [vmem:[%s2070_s8 + $0x108] sm:$0xff] %v280_v33  ;;  %283 = vst [vmem:[%s2070_s8 + $0x110] sm:$0xff] %v282_v34  ;;  %v290_v38 = vld [vmem:[%s2062_s5 + $0x390] sm:$0xff]  ;;  %v292_v39 = vld [vmem:[%s2062_s5 + $0x398] sm:$0xff] }
  0x4b   : > { %285 = vst [vmem:[%s2070_s8 + $0x118] sm:$0xff] %v284_v35  ;;  %287 = vst [vmem:[%s2070_s8 + $0x120] sm:$0xff] %v286_v36  ;;  %v294_v40 = vld [vmem:[%s2062_s5 + $0x3c0] sm:$0xff]  ;;  %v296_v41 = vld [vmem:[%s2062_s5 + $0x3c8] sm:$0xff] }
  0x4c   : > { %289 = vst [vmem:[%s2070_s8 + $0x128] sm:$0xff] %v288_v37  ;;  %291 = vst [vmem:[%s2070_s8 + $0x130] sm:$0xff] %v290_v38  ;;  %v298_v42 = vld [vmem:[%s2062_s5 + $0x3f0] sm:$0xff]  ;;  %v300_v43 = vld [vmem:[%s2062_s5 + $0x3f8] sm:$0xff] }
  0x4d   : > { %293 = vst [vmem:[%s2070_s8 + $0x138] sm:$0xff] %v292_v39  ;;  %295 = vst [vmem:[%s2070_s8 + $0x140] sm:$0xff] %v294_v40  ;;  %v302_v44 = vld [vmem:[%s2062_s5 + $0x420] sm:$0xff]  ;;  %v304_v45 = vld [vmem:[%s2062_s5 + $0x428] sm:$0xff] }
  0x4e   : > { %297 = vst [vmem:[%s2070_s8 + $0x148] sm:$0xff] %v296_v41  ;;  %299 = vst [vmem:[%s2070_s8 + $0x150] sm:$0xff] %v298_v42  ;;  %v306_v46 = vld [vmem:[%s2062_s5 + $0x450] sm:$0xff]  ;;  %v308_v47 = vld [vmem:[%s2062_s5 + $0x458] sm:$0xff] }
  0x4f   : > { %301 = vst [vmem:[%s2070_s8 + $0x158] sm:$0xff] %v300_v43  ;;  %303 = vst [vmem:[%s2070_s8 + $0x160] sm:$0xff] %v302_v44  ;;  %v310_v48 = vld [vmem:[%s2062_s5 + $0x480] sm:$0xff]  ;;  %v312_v49 = vld [vmem:[%s2062_s5 + $0x488] sm:$0xff] }
  0x50   : > { %305 = vst [vmem:[%s2070_s8 + $0x168] sm:$0xff] %v304_v45  ;;  %307 = vst [vmem:[%s2070_s8 + $0x170] sm:$0xff] %v306_v46 }
  0x51   : > { %309 = vst [vmem:[%s2070_s8 + $0x178] sm:$0xff] %v308_v47  ;;  %311 = vst [vmem:[%s2070_s8 + $0x180] sm:$0xff] %v310_v48 }
  0x52   : > { %313 = vst [vmem:[%s2070_s8 + $0x188] sm:$0xff] %v312_v49 }
  0x53 PF: > { %s320_s17 = sand.u32 1, %s1857_s22   ;;  %s1490_s29 = sshll.u32 %s1881_s27, 1 }
  0x54   : > { %s1488_s11 = sshll.u32 %s320_s17, 9  ;;  %s1605_s12 = smul.u32 192, %s1877_s26 }
  0x55   : > { %s324_s16 = scalar_lea.vmem [#allocation5], %s1488_s11  ;;  %s2687_s1 = sld [smem:[#allocation21_spill]] }
  0x56   : > { %s334_s0 = sshll.u32 %s324_s16, 4  ;;  %s331_s30 = sadd.s32 %s1605_s12, %s1490_s29  ;;  %s2169_s0 = int_to_ptr.vmem [resolvable:$true] %s334_s0 }
  0x57   : > { %s1492_s10 = sshll.u32 %s331_s30, 7  ;;  %s2176_s8 = scalar_lea.sflag [#allocation6], %s320_s17 }
  0x5b   : > { %s2174_s5 = scalar_lea.hbm %s2687_s1, %s1492_s10  ;;  %s1723_s30 = scalar_lea.hbm %s2687_s1, 73728 }
  0x5c   : > { %s1719_s22 = scalar_lea.hbm %s2174_s5, 8192  ;;  %p1724_p10 = scmp.lt.u32.totalorder %s2174_s5, %s2687_s1 }
  0x5d   : > { %p1720_p2 = scmp.ne.s32.totalorder %s2174_s5, %s1719_s22  ;;  %p1725_p11 = scmp.lt.u32.totalorder %s1723_s30, %s1719_s22 }
  0x5e   : > { %p1727_p0 = scmp.lt.u32.totalorder %s1719_s22, %s2174_s5 }
  0x5f   : > { %p1721_p5 = pnand %p1720_p2, %p2017_p9  ;;  %p1726_p13 = por %p1725_p11, %p1724_p10 }
  0x61   : > { %p1722_p8 = pneg %p1721_p5  ;;  %p1728_p1 = por %p1727_p0, %p1726_p13 }
  0x63   : > { %p1729_p7 = pnand %p1728_p1, %p1722_p8 }
  0x65   : > { %1732 = shalt.err (!%p1729_p7)
}
  0x66   : > { %s1733_s24 = scalar_lea.vmem %s2169_s0, 8192  ;;  %s1887_s10 = smov [#allocation5]  }
  0x67   : > { %p1734_p2 = scmp.ne.s32.totalorder %s2169_s0, %s1733_s24  ;;  %s1737_s14 = sshll.u32 %s1887_s10, 4  ;;  %s1738_s14 = int_to_ptr.vmem [resolvable:$false] %s1737_s14 }
  0x68   : > { %s1739_s17 = scalar_lea.vmem %s1738_s14, 16384  ;;  %p1740_p4 = scmp.lt.s32.totalorder %s2169_s0, %s1738_s14 }
  0x69   : > { %p1735_p5 = pnand %p1734_p2, %p2017_p9  ;;  %p1741_p12 = scmp.lt.s32.totalorder %s1739_s17, %s1733_s24 }
  0x6b   : > { %p1736_p6 = pneg %p1735_p5  ;;  %p1742_p10 = por %p1741_p12, %p1740_p4 }
  0x6d   : > { %p1743_p11 = pnand %p1742_p10, %p1736_p6 }
  0x6f   : > { %1746 = shalt.err (!%p1743_p11)
}
  0x70   : > { %s1888_s22 = smov 768   ;;  %s1889_s29 = smov 256  }
  0x71   : > { %s1890_s11 = smov 16   ;;  %s344_s30 = sand.u32 1, %s1845_s19  }
  0x72   : > { %1608 = dma.hbm_to_vmem [thread:$0]  (%p2017_p9), %s2174_s5, 8192, %s2169_s0, %s2176_s8, %s1888_s22, %s1889_s29, %s1890_s11  }
  0x73   : > { %s1506_s12 = sshll.u32 %s1881_s27, 5  ;;  %s1493_s16 = sshll.u32 %s344_s30, 1 }
  0x74   : > { %s2205_s14 = scalar_lea.hbm %s2660_s2, %s1506_s12  ;;  %s348_s17 = scalar_lea.vmem [#allocation7], %s1493_s16 }
  0x75   : > { %s356_s1 = sshll.u32 %s348_s17, 4  ;;  %s345_s26 = scalar_lea.sflag [#allocation8], %s344_s30  ;;  %s357_s1 = int_to_ptr.vmem [resolvable:$true] %s356_s1 }
  0x76   : > { %s1747_s6 = scalar_lea.hbm %s2205_s14, 32  ;;  %s1751_s5 = scalar_lea.hbm %s2660_s2, 96 }
  0x77   : > { %p1748_p12 = scmp.ne.s32.totalorder %s2205_s14, %s1747_s6  ;;  %p1752_p6 = scmp.lt.u32.totalorder %s2205_s14, %s2660_s2 }
  0x78   : > { %p1753_p8 = scmp.lt.u32.totalorder %s1751_s5, %s1747_s6  ;;  %p1755_p0 = scmp.lt.u32.totalorder %s1747_s6, %s2205_s14 }
  0x79   : > { %p1749_p9 = pnand %p1748_p12, %p2042_p3 }
  0x7a   : > { %p1754_p13 = por %p1753_p8, %p1752_p6 }
  0x7b   : > { %p1750_p4 = pneg %p1749_p9 }
  0x7c   : > { %p1756_p1 = por %p1755_p0, %p1754_p13 }
  0x7e   : > { %p1757_p7 = pnand %p1756_p1, %p1750_p4 }
  0x80   : > { %1760 = shalt.err (!%p1757_p7)
}
  0x81   : > { %s1761_s29 = scalar_lea.vmem %s357_s1, 32  ;;  %s1891_s11 = smov [#allocation7]  }
  0x82   : > { %p1762_p2 = scmp.ne.s32.totalorder %s357_s1, %s1761_s29  ;;  %s1765_s30 = sshll.u32 %s1891_s11, 4  ;;  %s1766_s30 = int_to_ptr.vmem [resolvable:$false] %s1765_s30 }
  0x83   : > { %s1767_s12 = scalar_lea.vmem %s1766_s30, 64  ;;  %p1768_p11 = scmp.lt.s32.totalorder %s357_s1, %s1766_s30 }
  0x84   : > { %p1763_p5 = pnand %p1762_p2, %p2042_p3  ;;  %p1769_p12 = scmp.lt.s32.totalorder %s1767_s12, %s1761_s29 }
  0x86   : > { %p1764_p10 = pneg %p1763_p5  ;;  %p1770_p9 = por %p1769_p12, %p1768_p11 }
  0x88   : > { %p1771_p6 = pnand %p1770_p9, %p1764_p10 }
  0x8a   : > { %1774 = shalt.err (!%p1771_p6)
}
  0x8b   : > { %1609 = dma.hbm_to_vmem [thread:$0]  (%p2042_p3), %s2205_s14, 32, %s357_s1, %s345_s26  }
  0x8c PF: > { %p1496_p4 = scmp.ge.s32.totalorder %s1885_s28, 1  ;;  %p361_p8 = scmp.lt.s32.totalorder %s1885_s28, 10 }
  0x8e   : > { %p362_p13 = pnand %p1496_p4, %p361_p8 }
  0x8f   : > { %s368_s6 = sand.u32 (!%p362_p13), 1, %s1861_s23   ;;  %s374_s16 = sand.u32 (!%p362_p13), 1, %s1853_s21  }
  0x90   : > { %365 = sbr.rel (%p362_p13) target bundleno = 573 (0x23d), region = 55  ;;  %s1497_s24 = sshll.u32 (!%p362_p13), %s374_s16, 9 }
  0x91   : > { %s1606_s10 = smul.u32 (!%p362_p13), 400, %s368_s6  ;;  %s375_s0 = scalar_lea.sflag (!%p362_p13), [#allocation6], %s374_s16 }
  0x92   : > { %s2230_s20 = scalar_lea.vmem (!%p362_p13), [#allocation5], %s1497_s24  ;;  %p2688_p3 = scmp.ne.s32.totalorder (!%p362_p13), %s2681_s15, 0 }
  0x93   : > { %s2228_s17 = scalar_lea.vmem (!%p362_p13), [#allocation4], %s1606_s10 }
  0x97   : > { %1828 = dma.done.wait (%p2688_p3), %s375_s0, 8192  }
  0x98   : > { %1830 = vsyncadd (%p2688_p3), %s375_s0, 4294959104  ;;  %s383_s1 = sand.u32 1, %s1841_s18   ;;  %p2689_p0 = scmp.ne.s32.totalorder %s2684_s7, 0 }
  0x99   : > { %s1498_s26 = sshll.u32 %s383_s1, 1  ;;  %s384_s14 = scalar_lea.sflag [#allocation8], %s383_s1 }
  0x9a   : > { %s387_s13 = scalar_lea.vmem [#allocation7], %s1498_s26 }
  0x9b   : > { %1832 = dma.done.wait (%p2689_p0), %s384_s14, 32  }
  0x9c   : > { %1834 = vsyncadd (%p2689_p0), %s384_s14, 4294967264  ;;  %s1607_s23 = smul.u32 400, %s383_s1  ;;  %p1499_p1 = scmp.ne.s32.totalorder %s1869_s3, 0 }
  0x9d   : > { %v433_v50 = vlaneseq (!%p1499_p1)  ;;  %v431_v52 = vld [vmem:[%s387_s13] sm:$0x3] (!%p1499_p1) }
  0x9e   : > { %s2241_s5 = scalar_lea.vmem [#allocation9], %s1607_s23  ;;  %430 = sbr.rel (%p1499_p1) target bundleno = 190 (0xbe), region = 71 }
  0x9f   : > { %v434_v51 = vshrl.u32 (!%p1499_p1), %v433_v50, 7 }
  0xa1   : > { %v435_v53 = vsub.s32 (!%p1499_p1), 0, %v434_v51  ;;  %v439_v54 = vsub.s32 (!%p1499_p1), 1, %v434_v51 }
  0xa3   : > { %v436_v55 = vrot.slane (!%p1499_p1), %v431_v52, %v435_v53  ;;  %v440_v56 = vrot.slane (!%p1499_p1), %v431_v52, %v439_v54 }
  0xa5   : > { %443 = vst [vmem:[#allocation2] sm:$0xff] %v436_v55  ;;  %445 = vst [vmem:[#allocation2 + $0x10] sm:$0xff] %v436_v55 }
  0xa6   : > { %447 = vst [vmem:[#allocation2 + $0x20] sm:$0xff] %v436_v55  ;;  %449 = vst [vmem:[#allocation2 + $0x30] sm:$0xff] %v436_v55 }
  0xa7   : > { %451 = vst [vmem:[#allocation2 + $0x40] sm:$0xff] %v436_v55  ;;  %453 = vst [vmem:[#allocation2 + $0x50] sm:$0xff] %v436_v55 }
  0xa8   : > { %455 = vst [vmem:[#allocation2 + $0x60] sm:$0xff] %v436_v55  ;;  %457 = vst [vmem:[#allocation2 + $0x70] sm:$0xff] %v436_v55 }
  0xa9   : > { %459 = vst [vmem:[#allocation2 + $0x80] sm:$0xff] %v436_v55  ;;  %461 = vst [vmem:[#allocation2 + $0x90] sm:$0xff] %v436_v55 }
  0xaa   : > { %463 = vst [vmem:[#allocation2 + $0xa0] sm:$0xff] %v436_v55  ;;  %465 = vst [vmem:[#allocation2 + $0xb0] sm:$0xff] %v436_v55 }
  0xab   : > { %467 = vst [vmem:[#allocation2 + $0xc0] sm:$0xff] %v436_v55  ;;  %469 = vst [vmem:[#allocation2 + $0xd0] sm:$0xff] %v436_v55 }
  0xac   : > { %471 = vst [vmem:[#allocation2 + $0xe0] sm:$0xff] %v436_v55  ;;  %473 = vst [vmem:[#allocation2 + $0xf0] sm:$0xff] %v436_v55 }
  0xad   : > { %475 = vst [vmem:[#allocation2 + $0x100] sm:$0xff] %v436_v55  ;;  %477 = vst [vmem:[#allocation2 + $0x110] sm:$0xff] %v436_v55 }
  0xae   : > { %479 = vst [vmem:[#allocation2 + $0x120] sm:$0xff] %v436_v55  ;;  %481 = vst [vmem:[#allocation2 + $0x130] sm:$0xff] %v436_v55 }
  0xaf   : > { %483 = vst [vmem:[#allocation2 + $0x140] sm:$0xff] %v436_v55  ;;  %485 = vst [vmem:[#allocation2 + $0x150] sm:$0xff] %v436_v55 }
  0xb0   : > { %487 = vst [vmem:[#allocation2 + $0x160] sm:$0xff] %v436_v55  ;;  %489 = vst [vmem:[#allocation2 + $0x170] sm:$0xff] %v436_v55 }
  0xb1   : > { %491 = vst [vmem:[#allocation2 + $0x180] sm:$0xff] %v436_v55  ;;  %444 = vst [vmem:[#allocation2 + $0x8] sm:$0xff] %v440_v56 }
  0xb2   : > { %446 = vst [vmem:[#allocation2 + $0x18] sm:$0xff] %v440_v56  ;;  %448 = vst [vmem:[#allocation2 + $0x28] sm:$0xff] %v440_v56 }
  0xb3   : > { %450 = vst [vmem:[#allocation2 + $0x38] sm:$0xff] %v440_v56  ;;  %452 = vst [vmem:[#allocation2 + $0x48] sm:$0xff] %v440_v56 }
  0xb4   : > { %454 = vst [vmem:[#allocation2 + $0x58] sm:$0xff] %v440_v56  ;;  %456 = vst [vmem:[#allocation2 + $0x68] sm:$0xff] %v440_v56 }
  0xb5   : > { %458 = vst [vmem:[#allocation2 + $0x78] sm:$0xff] %v440_v56  ;;  %460 = vst [vmem:[#allocation2 + $0x88] sm:$0xff] %v440_v56 }
  0xb6   : > { %462 = vst [vmem:[#allocation2 + $0x98] sm:$0xff] %v440_v56  ;;  %464 = vst [vmem:[#allocation2 + $0xa8] sm:$0xff] %v440_v56 }
  0xb7   : > { %466 = vst [vmem:[#allocation2 + $0xb8] sm:$0xff] %v440_v56  ;;  %468 = vst [vmem:[#allocation2 + $0xc8] sm:$0xff] %v440_v56 }
  0xb8   : > { %470 = vst [vmem:[#allocation2 + $0xd8] sm:$0xff] %v440_v56  ;;  %472 = vst [vmem:[#allocation2 + $0xe8] sm:$0xff] %v440_v56 }
  0xb9   : > { %474 = vst [vmem:[#allocation2 + $0xf8] sm:$0xff] %v440_v56  ;;  %476 = vst [vmem:[#allocation2 + $0x108] sm:$0xff] %v440_v56 }
  0xba   : > { %478 = vst [vmem:[#allocation2 + $0x118] sm:$0xff] %v440_v56  ;;  %480 = vst [vmem:[#allocation2 + $0x128] sm:$0xff] %v440_v56 }
  0xbb   : > { %482 = vst [vmem:[#allocation2 + $0x138] sm:$0xff] %v440_v56  ;;  %484 = vst [vmem:[#allocation2 + $0x148] sm:$0xff] %v440_v56 }
  0xbc   : > { %486 = vst [vmem:[#allocation2 + $0x158] sm:$0xff] %v440_v56  ;;  %488 = vst [vmem:[#allocation2 + $0x168] sm:$0xff] %v440_v56 }
  0xbd   : > { %490 = vst [vmem:[#allocation2 + $0x178] sm:$0xff] %v440_v56  ;;  %492 = vst [vmem:[#allocation2 + $0x188] sm:$0xff] %v440_v56 }
  0xbe PF: > { %v594_v57 = vld [vmem:[%s2230_s20 + $0x8] sm:$0xff]  ;;  %v596_v58 = vld [vmem:[%s2230_s20 + $0x18] sm:$0xff]  ;;  %v593_v59 = vld [vmem:[%s2230_s20] sm:$0xff]  ;;  %p1500_p7 = scmp.ne.s32.totalorder %s1869_s3, 2 }
  0xbf   : > { %v1508_v60 = vpack.c.bf16 %v596_v58, %v594_v57  ;;  %v595_v61 = vld [vmem:[%s2230_s20 + $0x10] sm:$0xff]  ;;  %v598_v62 = vld [vmem:[%s2230_s20 + $0x28] sm:$0xff]  ;;  %v600_v63 = vld [vmem:[%s2230_s20 + $0x38] sm:$0xff]  ;;  %s2359_s15 = sld [smem:[#allocation3]] (!%p1500_p7) }
  0xc0   : > { %v1510_v0 = vpack.c.bf16 %v595_v61, %v593_v59  ;;  %v1512_v1 = vpack.c.bf16 %v600_v63, %v598_v62  ;;  %v597_v2 = vld [vmem:[%s2230_s20 + $0x20] sm:$0xff]  ;;  %v599_v3 = vld [vmem:[%s2230_s20 + $0x30] sm:$0xff]  ;;  %v602_v4 = vld [vmem:[%s2230_s20 + $0x48] sm:$0xff] }
  0xc1   : > { %1509 = vmatprep.subr.bf16.mxu0 %v1508_v60  ;;  %1572 = vmatprep.subr.bf16.mxu1 %v1508_v60  ;;  %v604_v5 = vld [vmem:[%s2230_s20 + $0x58] sm:$0xff]  ;;  %v1514_v6 = vpack.c.bf16 %v599_v3, %v597_v2  ;;  %v601_v8 = vld [vmem:[%s2230_s20 + $0x40] sm:$0xff]  ;;  %v603_v9 = vld [vmem:[%s2230_s20 + $0x50] sm:$0xff] }
  0xc2   : > { %1511 = vmatpush1.bf16.msra.mxu0 %v1510_v0  ;;  %1588 = vmatpush1.bf16.msra.mxu1 %v1510_v0  ;;  %v1516_v7 = vpack.c.bf16 %v604_v5, %v602_v4  ;;  %v606_v10 = vld [vmem:[%s2230_s20 + $0x68] sm:$0xff]  ;;  %v608_v11 = vld [vmem:[%s2230_s20 + $0x78] sm:$0xff]  ;;  %v1518_v12 = vpack.c.bf16 %v603_v9, %v601_v8  ;;  %v605_v14 = vld [vmem:[%s2230_s20 + $0x60] sm:$0xff] }
  0xc3   : > { %1513 = vmatprep.subr.bf16.mxu0 %v1512_v1  ;;  %1573 = vmatprep.subr.bf16.mxu1 %v1512_v1  ;;  %v1520_v13 = vpack.c.bf16 %v608_v11, %v606_v10  ;;  %v607_v15 = vld [vmem:[%s2230_s20 + $0x70] sm:$0xff]  ;;  %v610_v16 = vld [vmem:[%s2230_s20 + $0x88] sm:$0xff]  ;;  %v612_v17 = vld [vmem:[%s2230_s20 + $0x98] sm:$0xff] }
  0xc4   : > { %v1522_v18 = vpack.c.bf16 %v607_v15, %v605_v14  ;;  %v1524_v19 = vpack.c.bf16 %v612_v17, %v610_v16  ;;  %v609_v20 = vld [vmem:[%s2230_s20 + $0x80] sm:$0xff]  ;;  %v611_v21 = vld [vmem:[%s2230_s20 + $0x90] sm:$0xff]  ;;  %v614_v22 = vld [vmem:[%s2230_s20 + $0xa8] sm:$0xff] }
  0xc5   : > { %v616_v23 = vld [vmem:[%s2230_s20 + $0xb8] sm:$0xff]  ;;  %v1526_v24 = vpack.c.bf16 %v611_v21, %v609_v20  ;;  %v613_v26 = vld [vmem:[%s2230_s20 + $0xa0] sm:$0xff]  ;;  %v615_v27 = vld [vmem:[%s2230_s20 + $0xb0] sm:$0xff] }
  0xc6   : > { %1515 = vmatpush1.bf16.msra.mxu0 %v1514_v6  ;;  %1589 = vmatpush1.bf16.msra.mxu1 %v1514_v6  ;;  %v1528_v25 = vpack.c.bf16 %v616_v23, %v614_v22  ;;  %v618_v28 = vld [vmem:[%s2230_s20 + $0xc8] sm:$0xff]  ;;  %v620_v29 = vld [vmem:[%s2230_s20 + $0xd8] sm:$0xff]  ;;  %v1530_v30 = vpack.c.bf16 %v615_v27, %v613_v26  ;;  %v617_v32 = vld [vmem:[%s2230_s20 + $0xc0] sm:$0xff] }
  0xc7   : > { %1517 = vmatprep.subr.bf16.mxu0 %v1516_v7  ;;  %1574 = vmatprep.subr.bf16.mxu1 %v1516_v7  ;;  %v1532_v31 = vpack.c.bf16 %v620_v29, %v618_v28  ;;  %v619_v33 = vld [vmem:[%s2230_s20 + $0xd0] sm:$0xff]  ;;  %v544_v34 = vld [vmem:[%s2228_s17 + $0x8] sm:$0xff]  ;;  %v570_v37 = vld [vmem:[%s2228_s17 + $0xd8] sm:$0xff] }
  0xc8   : > { %v622_v35 = vld [vmem:[%s2230_s20 + $0xe8] sm:$0xff]  ;;  %v624_v36 = vld [vmem:[%s2230_s20 + $0xf8] sm:$0xff]  ;;  %721 = vmatprep.mubr.f32.mxu0 %v544_v34  ;;  %799 = vmatprep.mubr.f32.mxu1 %v570_v37  ;;  %v1534_v38 = vpack.c.bf16 %v619_v33, %v617_v32  ;;  %v621_v40 = vld [vmem:[%s2230_s20 + $0xe0] sm:$0xff] }
  0xc9   : > { %v1536_v39 = vpack.c.bf16 %v624_v36, %v622_v35  ;;  %v623_v41 = vld [vmem:[%s2230_s20 + $0xf0] sm:$0xff]  ;;  %v626_v42 = vld [vmem:[%s2230_s20 + $0x108] sm:$0xff]  ;;  %v628_v43 = vld [vmem:[%s2230_s20 + $0x118] sm:$0xff] }
  0xca   : > { %1519 = vmatpush1.bf16.msra.mxu0 %v1518_v12  ;;  %1590 = vmatpush1.bf16.msra.mxu1 %v1518_v12  ;;  %v1538_v44 = vpack.c.bf16 %v623_v41, %v621_v40  ;;  %v1540_v45 = vpack.c.bf16 %v628_v43, %v626_v42  ;;  %v625_v46 = vld [vmem:[%s2230_s20 + $0x100] sm:$0xff]  ;;  %v627_v47 = vld [vmem:[%s2230_s20 + $0x110] sm:$0xff]  ;;  %v630_v48 = vld [vmem:[%s2230_s20 + $0x128] sm:$0xff] }
  0xcb   : > { %1521 = vmatprep.subr.bf16.mxu0 %v1520_v13  ;;  %1575 = vmatprep.subr.bf16.mxu1 %v1520_v13  ;;  %v632_v49 = vld [vmem:[%s2230_s20 + $0x138] sm:$0xff]  ;;  %v1542_v50 = vpack.c.bf16 %v627_v47, %v625_v46  ;;  %v629_v52 = vld [vmem:[%s2230_s20 + $0x120] sm:$0xff]  ;;  %v631_v53 = vld [vmem:[%s2230_s20 + $0x130] sm:$0xff] }
  0xcc   : > { %v1544_v51 = vpack.c.bf16 %v632_v49, %v630_v48  ;;  %v634_v54 = vld [vmem:[%s2230_s20 + $0x148] sm:$0xff]  ;;  %v636_v55 = vld [vmem:[%s2230_s20 + $0x158] sm:$0xff]  ;;  %v1546_v56 = vpack.c.bf16 %v631_v53, %v629_v52  ;;  %v633_v58 = vld [vmem:[%s2230_s20 + $0x140] sm:$0xff] }
  0xcd   : > { %v1548_v57 = vpack.c.bf16 %v636_v55, %v634_v54  ;;  %v635_v59 = vld [vmem:[%s2230_s20 + $0x150] sm:$0xff]  ;;  %v638_v60 = vld [vmem:[%s2230_s20 + $0x168] sm:$0xff]  ;;  %v640_v61 = vld [vmem:[%s2230_s20 + $0x178] sm:$0xff] }
  0xce   : > { %1523 = vmatpush1.bf16.msra.mxu0 %v1522_v18  ;;  %1591 = vmatpush1.bf16.msra.mxu1 %v1522_v18  ;;  %v1550_v62 = vpack.c.bf16 %v635_v59, %v633_v58  ;;  %v1552_v63 = vpack.c.bf16 %v640_v61, %v638_v60  ;;  %v637_v0 = vld [vmem:[%s2230_s20 + $0x160] sm:$0xff]  ;;  %v639_v1 = vld [vmem:[%s2230_s20 + $0x170] sm:$0xff]  ;;  %v642_v2 = vld [vmem:[%s2230_s20 + $0x188] sm:$0xff] }
  0xcf   : > { %1525 = vmatprep.subr.bf16.mxu0 %v1524_v19  ;;  %1576 = vmatprep.subr.bf16.mxu1 %v1524_v19  ;;  %v644_v3 = vld [vmem:[%s2230_s20 + $0x198] sm:$0xff]  ;;  %v1554_v4 = vpack.c.bf16 %v639_v1, %v637_v0  ;;  %v641_v6 = vld [vmem:[%s2230_s20 + $0x180] sm:$0xff]  ;;  %v643_v7 = vld [vmem:[%s2230_s20 + $0x190] sm:$0xff] }
  0xd0   : > { %v1556_v5 = vpack.c.bf16 %v644_v3, %v642_v2  ;;  %v646_v8 = vld [vmem:[%s2230_s20 + $0x1a8] sm:$0xff]  ;;  %v648_v9 = vld [vmem:[%s2230_s20 + $0x1b8] sm:$0xff]  ;;  %v1558_v10 = vpack.c.bf16 %v643_v7, %v641_v6  ;;  %v645_v12 = vld [vmem:[%s2230_s20 + $0x1a0] sm:$0xff] }
  0xd1   : > { %v1560_v11 = vpack.c.bf16 %v648_v9, %v646_v8  ;;  %v647_v13 = vld [vmem:[%s2230_s20 + $0x1b0] sm:$0xff]  ;;  %v650_v14 = vld [vmem:[%s2230_s20 + $0x1c8] sm:$0xff]  ;;  %v652_v15 = vld [vmem:[%s2230_s20 + $0x1d8] sm:$0xff] }
  0xd2   : > { %1527 = vmatpush1.bf16.msra.mxu0 %v1526_v24  ;;  %1592 = vmatpush1.bf16.msra.mxu1 %v1526_v24  ;;  %v1562_v16 = vpack.c.bf16 %v647_v13, %v645_v12  ;;  %v1564_v17 = vpack.c.bf16 %v652_v15, %v650_v14  ;;  %v649_v18 = vld [vmem:[%s2230_s20 + $0x1c0] sm:$0xff]  ;;  %v651_v19 = vld [vmem:[%s2230_s20 + $0x1d0] sm:$0xff]  ;;  %v654_v20 = vld [vmem:[%s2230_s20 + $0x1e8] sm:$0xff] }
  0xd3   : > { %1529 = vmatprep.subr.bf16.mxu0 %v1528_v25  ;;  %1577 = vmatprep.subr.bf16.mxu1 %v1528_v25  ;;  %v656_v21 = vld [vmem:[%s2230_s20 + $0x1f8] sm:$0xff]  ;;  %v1566_v22 = vpack.c.bf16 %v651_v19, %v649_v18  ;;  %v653_v24 = vld [vmem:[%s2230_s20 + $0x1e0] sm:$0xff]  ;;  %v655_v25 = vld [vmem:[%s2230_s20 + $0x1f0] sm:$0xff] }
  0xd4   : > { %v1568_v23 = vpack.c.bf16 %v656_v21, %v654_v20  ;;  %v1570_v26 = vpack.c.bf16 %v655_v25, %v653_v24  ;;  %v543_v27 = vld [vmem:[%s2228_s17] sm:$0xff]  ;;  %v569_v28 = vld [vmem:[%s2228_s17 + $0xd0] sm:$0xff]  ;;  %v546_v29 = vld [vmem:[%s2228_s17 + $0x18] sm:$0xff] }
  0xd5   : > { %v571_v32 = vld [vmem:[%s2228_s17 + $0xe0] sm:$0xff]  ;;  %v548_v33 = vld [vmem:[%s2228_s17 + $0x28] sm:$0xff]  ;;  %v574_v34 = vld [vmem:[%s2228_s17 + $0xf8] sm:$0xff] }
  0xd6   : > { %1531 = vmatpush1.bf16.msra.mxu0 %v1530_v30  ;;  %1593 = vmatpush1.bf16.msra.mxu1 %v1530_v30  ;;  %v572_v30 = vld [vmem:[%s2228_s17 + $0xe8] sm:$0xff]  ;;  %v547_v35 = vld [vmem:[%s2228_s17 + $0x20] sm:$0xff]  ;;  %v573_v36 = vld [vmem:[%s2228_s17 + $0xf0] sm:$0xff] }
  0xd7   : > { %1533 = vmatprep.subr.bf16.mxu0 %v1532_v31  ;;  %1578 = vmatprep.subr.bf16.mxu1 %v1532_v31  ;;  %v545_v31 = vld [vmem:[%s2228_s17 + $0x10] sm:$0xff]  ;;  %v550_v37 = vld [vmem:[%s2228_s17 + $0x38] sm:$0xff]  ;;  %v575_v40 = vld [vmem:[%s2228_s17 + $0x100] sm:$0xff] }
  0xd8   : > { %v552_v41 = vld [vmem:[%s2228_s17 + $0x48] sm:$0xff]  ;;  %v578_v42 = vld [vmem:[%s2228_s17 + $0x118] sm:$0xff]  ;;  %v551_v43 = vld [vmem:[%s2228_s17 + $0x40] sm:$0xff] }
  0xd9   : > { %v580_v46 = vld [vmem:[%s2228_s17 + $0x128] sm:$0xff]  ;;  %v553_v47 = vld [vmem:[%s2228_s17 + $0x50] sm:$0xff]  ;;  %v579_v48 = vld [vmem:[%s2228_s17 + $0x120] sm:$0xff] }
  0xda   : > { %1535 = vmatpush1.bf16.msra.mxu0 %v1534_v38  ;;  %1594 = vmatpush1.bf16.msra.mxu1 %v1534_v38  ;;  %v576_v38 = vld [vmem:[%s2228_s17 + $0x108] sm:$0xff]  ;;  %v581_v52 = vld [vmem:[%s2228_s17 + $0x130] sm:$0xff]  ;;  %v558_v53 = vld [vmem:[%s2228_s17 + $0x78] sm:$0xff] }
  0xdb   : > { %1537 = vmatprep.subr.bf16.mxu0 %v1536_v39  ;;  %1579 = vmatprep.subr.bf16.mxu1 %v1536_v39  ;;  %v549_v39 = vld [vmem:[%s2228_s17 + $0x30] sm:$0xff]  ;;  %v556_v49 = vld [vmem:[%s2228_s17 + $0x68] sm:$0xff]  ;;  %v586_v58 = vld [vmem:[%s2228_s17 + $0x158] sm:$0xff] }
  0xdc   : > { %v584_v54 = vld [vmem:[%s2228_s17 + $0x148] sm:$0xff]  ;;  %v557_v55 = vld [vmem:[%s2228_s17 + $0x70] sm:$0xff]  ;;  %v559_v59 = vld [vmem:[%s2228_s17 + $0x80] sm:$0xff] }
  0xdd   : > { %v585_v60 = vld [vmem:[%s2228_s17 + $0x150] sm:$0xff]  ;;  %v562_v61 = vld [vmem:[%s2228_s17 + $0x98] sm:$0xff]  ;;  %v587_v0 = vld [vmem:[%s2228_s17 + $0x160] sm:$0xff] }
  0xde   : > { %1539 = vmatpush1.bf16.msra.mxu0 %v1538_v44  ;;  %1595 = vmatpush1.bf16.msra.mxu1 %v1538_v44  ;;  %v577_v44 = vld [vmem:[%s2228_s17 + $0x110] sm:$0xff]  ;;  %v564_v1 = vld [vmem:[%s2228_s17 + $0xa8] sm:$0xff]  ;;  %v590_v2 = vld [vmem:[%s2228_s17 + $0x178] sm:$0xff] }
  0xdf   : > { %1541 = vmatprep.subr.bf16.mxu0 %v1540_v45  ;;  %1580 = vmatprep.subr.bf16.mxu1 %v1540_v45  ;;  %v554_v45 = vld [vmem:[%s2228_s17 + $0x58] sm:$0xff]  ;;  %v563_v3 = vld [vmem:[%s2228_s17 + $0xa0] sm:$0xff]  ;;  %v592_v6 = vld [vmem:[%s2228_s17 + $0x188] sm:$0xff] }
  0xe0   : > { %v565_v7 = vld [vmem:[%s2228_s17 + $0xb0] sm:$0xff]  ;;  %v591_v8 = vld [vmem:[%s2228_s17 + $0x180] sm:$0xff]  ;;  %v568_v9 = vld [vmem:[%s2228_s17 + $0xc8] sm:$0xff] }
  0xe1   : > { %v519_v12 = vld [vmem:[#allocation2 + $0xd0] sm:$0xff]  ;;  %v494_v13 = vld [vmem:[#allocation2 + $0x8] sm:$0xff]  ;;  %v520_v14 = vld [vmem:[#allocation2 + $0xd8] sm:$0xff] }
  0xe2   : > { %1543 = vmatpush1.bf16.msra.mxu0 %v1542_v50  ;;  %1596 = vmatpush1.bf16.msra.mxu1 %v1542_v50  ;;  %v582_v50 = vld [vmem:[%s2228_s17 + $0x138] sm:$0xff]  ;;  %v521_v24 = vld [vmem:[#allocation2 + $0xe0] sm:$0xff] }
  0xe3   : > { %1545 = vmatprep.subr.bf16.mxu0 %v1544_v51  ;;  %1581 = vmatprep.subr.bf16.mxu1 %v1544_v51  ;;  %v555_v51 = vld [vmem:[%s2228_s17 + $0x60] sm:$0xff]  ;;  %v496_v25 = vld [vmem:[#allocation2 + $0x18] sm:$0xff] }
  0xe6   : > { %1547 = vmatpush1.bf16.msra.mxu0 %v1546_v56  ;;  %1597 = vmatpush1.bf16.msra.mxu1 %v1546_v56  ;;  %v583_v56 = vld [vmem:[%s2228_s17 + $0x140] sm:$0xff] }
  0xe7   : > { %1549 = vmatprep.subr.bf16.mxu0 %v1548_v57  ;;  %1582 = vmatprep.subr.bf16.mxu1 %v1548_v57  ;;  %v560_v57 = vld [vmem:[%s2228_s17 + $0x88] sm:$0xff] }
  0xea   : > { %1551 = vmatpush1.bf16.msra.mxu0 %v1550_v62  ;;  %1598 = vmatpush1.bf16.msra.mxu1 %v1550_v62  ;;  %v588_v62 = vld [vmem:[%s2228_s17 + $0x168] sm:$0xff] }
  0xeb   : > { %1553 = vmatprep.subr.bf16.mxu0 %v1552_v63  ;;  %1583 = vmatprep.subr.bf16.mxu1 %v1552_v63  ;;  %v561_v63 = vld [vmem:[%s2228_s17 + $0x90] sm:$0xff] }
  0xee   : > { %1555 = vmatpush1.bf16.msra.mxu0 %v1554_v4  ;;  %1599 = vmatpush1.bf16.msra.mxu1 %v1554_v4  ;;  %v589_v4 = vld [vmem:[%s2228_s17 + $0x170] sm:$0xff] }
  0xef   : > { %1557 = vmatprep.subr.bf16.mxu0 %v1556_v5  ;;  %1584 = vmatprep.subr.bf16.mxu1 %v1556_v5  ;;  %v566_v5 = vld [vmem:[%s2228_s17 + $0xb8] sm:$0xff] }
  0xf2   : > { %1559 = vmatpush1.bf16.msra.mxu0 %v1558_v10  ;;  %1600 = vmatpush1.bf16.msra.mxu1 %v1558_v10  ;;  %v567_v10 = vld [vmem:[%s2228_s17 + $0xc0] sm:$0xff] }
  0xf3   : > { %1561 = vmatprep.subr.bf16.mxu0 %v1560_v11  ;;  %1585 = vmatprep.subr.bf16.mxu1 %v1560_v11  ;;  %v493_v11 = vld [vmem:[#allocation2] sm:$0xff] }
  0xf6   : > { %1563 = vmatpush1.bf16.msra.mxu0 %v1562_v16  ;;  %1601 = vmatpush1.bf16.msra.mxu1 %v1562_v16 }
  0xf7   : > { %1565 = vmatprep.subr.bf16.mxu0 %v1564_v17  ;;  %1586 = vmatprep.subr.bf16.mxu1 %v1564_v17 }
  0xfa   : > { %1567 = vmatpush1.bf16.msra.mxu0 %v1566_v22  ;;  %1602 = vmatpush1.bf16.msra.mxu1 %v1566_v22  ;;  %v495_v22 = vld [vmem:[#allocation2 + $0x10] sm:$0xff] }
  0xfb   : > { %1569 = vmatprep.subr.bf16.mxu0 %v1568_v23  ;;  %1587 = vmatprep.subr.bf16.mxu1 %v1568_v23 }
  0xfe   : > { %1571 = vmatpush1.bf16.msra.mxu0 %v1570_v26  ;;  %1603 = vmatpush1.bf16.msra.mxu1 %v1570_v26  ;;  %v522_v26 = vld [vmem:[#allocation2 + $0xe8] sm:$0xff] }
 0x101   : > { %722 = vmatmul.mubr.f32.vlgmr.msra.gmra.mrb[0].mxu0 %v543_v27  ;;  %800 = vmatmul.mubr.f32.vlgmr.msra.gmra.mrb[0].mxu1 %v569_v28 }
 0x102   : > { %727 = vmatprep.mubr.f32.mxu0 %v546_v29  ;;  %805 = vmatprep.mubr.f32.mxu1 %v572_v30 }
 0x105   : > { %728 = vmatmul.mubr.f32.gmra.mrb[2].mxu0 %v545_v31  ;;  %806 = vmatmul.mubr.f32.gmra.mrb[2].mxu1 %v571_v32 }
 0x106   : > { %733 = vmatprep.mubr.f32.mxu0 %v548_v33  ;;  %811 = vmatprep.mubr.f32.mxu1 %v574_v34  ;;  %v497_v34 = vld [vmem:[#allocation2 + $0x20] sm:$0xff] }
 0x109   : > { %734 = vmatmul.mubr.f32.gmra.mrb[4].mxu0 %v547_v35  ;;  %812 = vmatmul.mubr.f32.gmra.mrb[4].mxu1 %v573_v36  ;;  %v523_v36 = vld [vmem:[#allocation2 + $0xf0] sm:$0xff] }
 0x10a   : > { %739 = vmatprep.mubr.f32.mxu0 %v550_v37  ;;  %817 = vmatprep.mubr.f32.mxu1 %v576_v38  ;;  %v498_v37 = vld [vmem:[#allocation2 + $0x28] sm:$0xff]  ;;  %v524_v38 = vld [vmem:[#allocation2 + $0xf8] sm:$0xff] }
 0x10d   : > { %740 = vmatmul.mubr.f32.gmra.mrb[6].mxu0 %v549_v39  ;;  %818 = vmatmul.mubr.f32.gmra.mrb[6].mxu1 %v575_v40 }
 0x10e   : > { %745 = vmatprep.mubr.f32.mxu0 %v552_v41  ;;  %823 = vmatprep.mubr.f32.mxu1 %v578_v42 }
 0x111   : > { %746 = vmatmul.mubr.f32.gmra.mrb[8].mxu0 %v551_v43  ;;  %824 = vmatmul.mubr.f32.gmra.mrb[8].mxu1 %v577_v44 }
 0x112   : > { %751 = vmatprep.mubr.f32.mxu0 %v554_v45  ;;  %829 = vmatprep.mubr.f32.mxu1 %v580_v46  ;;  %v499_v46 = vld [vmem:[#allocation2 + $0x30] sm:$0xff] }
 0x115   : > { %752 = vmatmul.mubr.f32.gmra.mrb[10].mxu0 %v553_v47  ;;  %830 = vmatmul.mubr.f32.gmra.mrb[10].mxu1 %v579_v48  ;;  %v525_v48 = vld [vmem:[#allocation2 + $0x100] sm:$0xff] }
 0x116   : > { %757 = vmatprep.mubr.f32.mxu0 %v556_v49  ;;  %835 = vmatprep.mubr.f32.mxu1 %v582_v50  ;;  %v500_v49 = vld [vmem:[#allocation2 + $0x38] sm:$0xff]  ;;  %v526_v50 = vld [vmem:[#allocation2 + $0x108] sm:$0xff] }
 0x119   : > { %758 = vmatmul.mubr.f32.gmra.mrb[12].mxu0 %v555_v51  ;;  %836 = vmatmul.mubr.f32.gmra.mrb[12].mxu1 %v581_v52 }
 0x11a   : > { %763 = vmatprep.mubr.f32.mxu0 %v558_v53  ;;  %841 = vmatprep.mubr.f32.mxu1 %v584_v54 }
 0x11d   : > { %764 = vmatmul.mubr.f32.gmra.mrb[14].mxu0 %v557_v55  ;;  %842 = vmatmul.mubr.f32.gmra.mrb[14].mxu1 %v583_v56 }
 0x11e   : > { %769 = vmatprep.mubr.f32.mxu0 %v560_v57  ;;  %847 = vmatprep.mubr.f32.mxu1 %v586_v58  ;;  %v501_v58 = vld [vmem:[#allocation2 + $0x40] sm:$0xff] }
 0x121   : > { %770 = vmatmul.mubr.f32.gmra.mrb[16].mxu0 %v559_v59  ;;  %848 = vmatmul.mubr.f32.gmra.mrb[16].mxu1 %v585_v60  ;;  %v527_v60 = vld [vmem:[#allocation2 + $0x110] sm:$0xff] }
 0x122   : > { %775 = vmatprep.mubr.f32.mxu0 %v562_v61  ;;  %853 = vmatprep.mubr.f32.mxu1 %v588_v62  ;;  %v502_v61 = vld [vmem:[#allocation2 + $0x48] sm:$0xff]  ;;  %v528_v62 = vld [vmem:[#allocation2 + $0x118] sm:$0xff] }
 0x125   : > { %776 = vmatmul.mubr.f32.gmra.mrb[18].mxu0 %v561_v63  ;;  %854 = vmatmul.mubr.f32.gmra.mrb[18].mxu1 %v587_v0 }
 0x126   : > { %781 = vmatprep.mubr.f32.mxu0 %v564_v1  ;;  %859 = vmatprep.mubr.f32.mxu1 %v590_v2 }
 0x129   : > { %782 = vmatmul.mubr.f32.gmra.mrb[20].mxu0 %v563_v3  ;;  %860 = vmatmul.mubr.f32.gmra.mrb[20].mxu1 %v589_v4 }
 0x12a   : > { %787 = vmatprep.mubr.f32.mxu0 %v566_v5  ;;  %865 = vmatprep.mubr.f32.mxu1 %v592_v6  ;;  %v503_v6 = vld [vmem:[#allocation2 + $0x50] sm:$0xff] }
 0x12d   : > { %788 = vmatmul.mubr.f32.gmra.mrb[22].mxu0 %v565_v7  ;;  %866 = vmatmul.mubr.f32.gmra.mrb[22].mxu1 %v591_v8  ;;  %v529_v8 = vld [vmem:[#allocation2 + $0x120] sm:$0xff] }
 0x12e   : > { %793 = vmatprep.mubr.f32.mxu0 %v568_v9  ;;  %v504_v9 = vld [vmem:[#allocation2 + $0x58] sm:$0xff] }
 0x131   : > { %794 = vmatmul.mubr.f32.gmra.mrb[24].mxu0 %v567_v10  ;;  %v530_v10 = vld [vmem:[#allocation2 + $0x128] sm:$0xff] }
 0x1d4   : > { %v723_v15 = vpop.f32.mrb[0].mxu0  ;;  %v801_v16 = vpop.f32.mrb[0].mxu1 }
 0x1d5   : > { %v872_v17 = vadd.f32 %v723_v15, %v493_v11  ;;  %v725_v18 = vpop.f32.mrb[1].mxu0  ;;  %v898_v19 = vadd.f32 %v801_v16, %v519_v12  ;;  %v803_v20 = vpop.f32.mrb[1].mxu1 }
 0x1d6   : > { %v873_v21 = vadd.f32 %v725_v18, %v494_v13  ;;  %v899_v23 = vadd.f32 %v803_v20, %v520_v14  ;;  %v505_v18 = vld [vmem:[#allocation2 + $0x60] sm:$0xff]  ;;  %v531_v20 = vld [vmem:[#allocation2 + $0x130] sm:$0xff] }
 0x1d7   : > { %922 = vst [vmem:[#allocation2] sm:$0xff] %v872_v17  ;;  %948 = vst [vmem:[#allocation2 + $0xd0] sm:$0xff] %v898_v19 }
 0x1d8   : > { %923 = vst [vmem:[#allocation2 + $0x8] sm:$0xff] %v873_v21  ;;  %v729_v27 = vpop.f32.mrb[2].mxu0  ;;  %949 = vst [vmem:[#allocation2 + $0xd8] sm:$0xff] %v899_v23  ;;  %v807_v28 = vpop.f32.mrb[2].mxu1  ;;  %v506_v21 = vld [vmem:[#allocation2 + $0x68] sm:$0xff] }
 0x1d9   : > { %v874_v29 = vadd.f32 %v729_v27, %v495_v22  ;;  %v731_v30 = vpop.f32.mrb[3].mxu0  ;;  %v900_v31 = vadd.f32 %v807_v28, %v521_v24  ;;  %v809_v32 = vpop.f32.mrb[3].mxu1  ;;  %v532_v22 = vld [vmem:[#allocation2 + $0x138] sm:$0xff] }
 0x1da   : > { %v875_v33 = vadd.f32 %v731_v30, %v496_v25  ;;  %v901_v35 = vadd.f32 %v809_v32, %v522_v26  ;;  %v507_v30 = vld [vmem:[#allocation2 + $0x70] sm:$0xff]  ;;  %v533_v32 = vld [vmem:[#allocation2 + $0x140] sm:$0xff] }
 0x1db   : > { %924 = vst [vmem:[#allocation2 + $0x10] sm:$0xff] %v874_v29  ;;  %950 = vst [vmem:[#allocation2 + $0xe0] sm:$0xff] %v900_v31 }
 0x1dc   : > { %925 = vst [vmem:[#allocation2 + $0x18] sm:$0xff] %v875_v33  ;;  %v735_v39 = vpop.f32.mrb[4].mxu0  ;;  %951 = vst [vmem:[#allocation2 + $0xe8] sm:$0xff] %v901_v35  ;;  %v813_v40 = vpop.f32.mrb[4].mxu1  ;;  %v508_v33 = vld [vmem:[#allocation2 + $0x78] sm:$0xff] }
 0x1dd   : > { %v876_v41 = vadd.f32 %v735_v39, %v497_v34  ;;  %v737_v42 = vpop.f32.mrb[5].mxu0  ;;  %v902_v43 = vadd.f32 %v813_v40, %v523_v36  ;;  %v815_v44 = vpop.f32.mrb[5].mxu1  ;;  %v534_v34 = vld [vmem:[#allocation2 + $0x148] sm:$0xff] }
 0x1de   : > { %v877_v45 = vadd.f32 %v737_v42, %v498_v37  ;;  %v903_v47 = vadd.f32 %v815_v44, %v524_v38  ;;  %v509_v42 = vld [vmem:[#allocation2 + $0x80] sm:$0xff]  ;;  %v535_v44 = vld [vmem:[#allocation2 + $0x150] sm:$0xff] }
 0x1df   : > { %926 = vst [vmem:[#allocation2 + $0x20] sm:$0xff] %v876_v41  ;;  %952 = vst [vmem:[#allocation2 + $0xf0] sm:$0xff] %v902_v43 }
 0x1e0   : > { %927 = vst [vmem:[#allocation2 + $0x28] sm:$0xff] %v877_v45  ;;  %v741_v51 = vpop.f32.mrb[6].mxu0  ;;  %953 = vst [vmem:[#allocation2 + $0xf8] sm:$0xff] %v903_v47  ;;  %v819_v52 = vpop.f32.mrb[6].mxu1  ;;  %v510_v45 = vld [vmem:[#allocation2 + $0x88] sm:$0xff] }
 0x1e1   : > { %v878_v53 = vadd.f32 %v741_v51, %v499_v46  ;;  %v743_v54 = vpop.f32.mrb[7].mxu0  ;;  %v904_v55 = vadd.f32 %v819_v52, %v525_v48  ;;  %v821_v56 = vpop.f32.mrb[7].mxu1  ;;  %v536_v46 = vld [vmem:[#allocation2 + $0x158] sm:$0xff] }
 0x1e2   : > { %v879_v57 = vadd.f32 %v743_v54, %v500_v49  ;;  %v905_v59 = vadd.f32 %v821_v56, %v526_v50  ;;  %v511_v54 = vld [vmem:[#allocation2 + $0x90] sm:$0xff]  ;;  %v537_v56 = vld [vmem:[#allocation2 + $0x160] sm:$0xff] }
 0x1e3   : > { %928 = vst [vmem:[#allocation2 + $0x30] sm:$0xff] %v878_v53  ;;  %954 = vst [vmem:[#allocation2 + $0x100] sm:$0xff] %v904_v55 }
 0x1e4   : > { %929 = vst [vmem:[#allocation2 + $0x38] sm:$0xff] %v879_v57  ;;  %v747_v63 = vpop.f32.mrb[8].mxu0  ;;  %955 = vst [vmem:[#allocation2 + $0x108] sm:$0xff] %v905_v59  ;;  %v825_v0 = vpop.f32.mrb[8].mxu1  ;;  %v512_v57 = vld [vmem:[#allocation2 + $0x98] sm:$0xff] }
 0x1e5   : > { %v880_v1 = vadd.f32 %v747_v63, %v501_v58  ;;  %v749_v2 = vpop.f32.mrb[9].mxu0  ;;  %v906_v3 = vadd.f32 %v825_v0, %v527_v60  ;;  %v827_v4 = vpop.f32.mrb[9].mxu1  ;;  %v538_v58 = vld [vmem:[#allocation2 + $0x168] sm:$0xff] }
 0x1e6   : > { %v881_v5 = vadd.f32 %v749_v2, %v502_v61  ;;  %v907_v7 = vadd.f32 %v827_v4, %v528_v62  ;;  %v513_v2 = vld [vmem:[#allocation2 + $0xa0] sm:$0xff]  ;;  %v539_v4 = vld [vmem:[#allocation2 + $0x170] sm:$0xff] }
 0x1e7   : > { %930 = vst [vmem:[#allocation2 + $0x40] sm:$0xff] %v880_v1  ;;  %956 = vst [vmem:[#allocation2 + $0x110] sm:$0xff] %v906_v3 }
 0x1e8   : > { %931 = vst [vmem:[#allocation2 + $0x48] sm:$0xff] %v881_v5  ;;  %v753_v11 = vpop.f32.mrb[10].mxu0  ;;  %957 = vst [vmem:[#allocation2 + $0x118] sm:$0xff] %v907_v7  ;;  %v831_v12 = vpop.f32.mrb[10].mxu1  ;;  %v514_v5 = vld [vmem:[#allocation2 + $0xa8] sm:$0xff] }
 0x1e9   : > { %v882_v13 = vadd.f32 %v753_v11, %v503_v6  ;;  %v755_v14 = vpop.f32.mrb[11].mxu0  ;;  %v908_v15 = vadd.f32 %v831_v12, %v529_v8  ;;  %v833_v16 = vpop.f32.mrb[11].mxu1  ;;  %v540_v6 = vld [vmem:[#allocation2 + $0x178] sm:$0xff] }
 0x1ea   : > { %v883_v17 = vadd.f32 %v755_v14, %v504_v9  ;;  %v909_v19 = vadd.f32 %v833_v16, %v530_v10  ;;  %v515_v14 = vld [vmem:[#allocation2 + $0xb0] sm:$0xff]  ;;  %v541_v16 = vld [vmem:[#allocation2 + $0x180] sm:$0xff] }
 0x1eb   : > { %932 = vst [vmem:[#allocation2 + $0x50] sm:$0xff] %v882_v13  ;;  %958 = vst [vmem:[#allocation2 + $0x120] sm:$0xff] %v908_v15 }
 0x1ec   : > { %933 = vst [vmem:[#allocation2 + $0x58] sm:$0xff] %v883_v17  ;;  %v759_v23 = vpop.f32.mrb[12].mxu0  ;;  %959 = vst [vmem:[#allocation2 + $0x128] sm:$0xff] %v909_v19  ;;  %v837_v24 = vpop.f32.mrb[12].mxu1  ;;  %v516_v17 = vld [vmem:[#allocation2 + $0xb8] sm:$0xff] }
 0x1ed   : > { %v884_v25 = vadd.f32 %v759_v23, %v505_v18  ;;  %v761_v26 = vpop.f32.mrb[13].mxu0  ;;  %v910_v27 = vadd.f32 %v837_v24, %v531_v20  ;;  %v839_v28 = vpop.f32.mrb[13].mxu1  ;;  %v542_v18 = vld [vmem:[#allocation2 + $0x188] sm:$0xff] }
 0x1ee   : > { %v885_v29 = vadd.f32 %v761_v26, %v506_v21  ;;  %v911_v31 = vadd.f32 %v839_v28, %v532_v22  ;;  %v517_v26 = vld [vmem:[#allocation2 + $0xc0] sm:$0xff]  ;;  %v518_v28 = vld [vmem:[#allocation2 + $0xc8] sm:$0xff] }
 0x1ef   : > { %934 = vst [vmem:[#allocation2 + $0x60] sm:$0xff] %v884_v25  ;;  %960 = vst [vmem:[#allocation2 + $0x130] sm:$0xff] %v910_v27 }
 0x1f0   : > { %935 = vst [vmem:[#allocation2 + $0x68] sm:$0xff] %v885_v29  ;;  %v765_v35 = vpop.f32.mrb[14].mxu0  ;;  %961 = vst [vmem:[#allocation2 + $0x138] sm:$0xff] %v911_v31  ;;  %v843_v36 = vpop.f32.mrb[14].mxu1 }
 0x1f1   : > { %v886_v37 = vadd.f32 %v765_v35, %v507_v30  ;;  %v767_v38 = vpop.f32.mrb[15].mxu0  ;;  %v912_v39 = vadd.f32 %v843_v36, %v533_v32  ;;  %v845_v40 = vpop.f32.mrb[15].mxu1  ;;  %v978_v35 = vld [vmem:[#allocation2 + $0x10] sm:$0xff] (!%p1500_p7)  ;;  %v979_v36 = vld [vmem:[#allocation2 + $0x18] sm:$0xff] (!%p1500_p7) }
 0x1f2   : > { %v887_v41 = vadd.f32 %v767_v38, %v508_v33  ;;  %v913_v43 = vadd.f32 %v845_v40, %v534_v34  ;;  %v976_v33 = vld [vmem:[#allocation2] sm:$0xff] (!%p1500_p7)  ;;  %v977_v34 = vld [vmem:[#allocation2 + $0x8] sm:$0xff] (!%p1500_p7)  ;;  %vm1029_vm2 = vcmp.ge.f32.partialorder (!%p1500_p7), %v978_v35, 0.0  ;;  %vm1030_vm3 = vcmp.ge.f32.partialorder (!%p1500_p7), %v979_v36, 0.0  ;;  %v983_v40 = vld [vmem:[#allocation2 + $0x38] sm:$0xff] (!%p1500_p7) }
 0x1f3   : > { %936 = vst [vmem:[#allocation2 + $0x70] sm:$0xff] %v886_v37  ;;  %962 = vst [vmem:[#allocation2 + $0x140] sm:$0xff] %v912_v39  ;;  %vm1027_vm0 = vcmp.ge.f32.partialorder (!%p1500_p7), %v976_v33, 0.0  ;;  %vm1028_vm1 = vcmp.ge.f32.partialorder (!%p1500_p7), %v977_v34, 0.0  ;;  %v980_v37 = vld [vmem:[#allocation2 + $0x20] sm:$0xff] (!%p1500_p7)  ;;  %v981_v38 = vld [vmem:[#allocation2 + $0x28] sm:$0xff] (!%p1500_p7) }
 0x1f4   : > { %937 = vst [vmem:[#allocation2 + $0x78] sm:$0xff] %v887_v41  ;;  %v771_v47 = vpop.f32.mrb[16].mxu0  ;;  %963 = vst [vmem:[#allocation2 + $0x148] sm:$0xff] %v913_v43  ;;  %v849_v48 = vpop.f32.mrb[16].mxu1  ;;  %vm1031_vm4 = vcmp.ge.f32.partialorder (!%p1500_p7), %v980_v37, 0.0  ;;  %vm1032_vm5 = vcmp.ge.f32.partialorder (!%p1500_p7), %v981_v38, 0.0 }
 0x1f5   : > { %v888_v49 = vadd.f32 %v771_v47, %v509_v42  ;;  %v773_v50 = vpop.f32.mrb[17].mxu0  ;;  %v914_v51 = vadd.f32 %v849_v48, %v535_v44  ;;  %v851_v52 = vpop.f32.mrb[17].mxu1  ;;  %v982_v39 = vld [vmem:[#allocation2 + $0x30] sm:$0xff] (!%p1500_p7)  ;;  %v984_v41 = vld [vmem:[#allocation2 + $0x40] sm:$0xff] (!%p1500_p7)  ;;  %vm1034_vm7 = vcmp.ge.f32.partialorder (!%p1500_p7), %v983_v40, 0.0  ;;  %v985_v42 = vld [vmem:[#allocation2 + $0x48] sm:$0xff] (!%p1500_p7) }
 0x1f6   : > { %v889_v53 = vadd.f32 %v773_v50, %v510_v45  ;;  %v915_v55 = vadd.f32 %v851_v52, %v536_v46  ;;  %vm1033_vm6 = vcmp.ge.f32.partialorder (!%p1500_p7), %v982_v39, 0.0  ;;  %vm1035_vm8 = vcmp.ge.f32.partialorder (!%p1500_p7), %v984_v41, 0.0  ;;  %v986_v43 = vld [vmem:[#allocation2 + $0x50] sm:$0xff] (!%p1500_p7)  ;;  %v987_v44 = vld [vmem:[#allocation2 + $0x58] sm:$0xff] (!%p1500_p7)  ;;  %v988_v45 = vld [vmem:[#allocation2 + $0x60] sm:$0xff] (!%p1500_p7) }
 0x1f7   : > { %938 = vst [vmem:[#allocation2 + $0x80] sm:$0xff] %v888_v49  ;;  %964 = vst [vmem:[#allocation2 + $0x150] sm:$0xff] %v914_v51  ;;  %vm1037_vm10 = vcmp.ge.f32.partialorder (!%p1500_p7), %v986_v43, 0.0  ;;  %v989_v46 = vld [vmem:[#allocation2 + $0x68] sm:$0xff] (!%p1500_p7)  ;;  %vm1039_vm12 = vcmp.ge.f32.partialorder (!%p1500_p7), %v988_v45, 0.0  ;;  %v2366_v51 = vstv (!%p1500_p7), %s2359_s15 }
 0x1f8   : > { %939 = vst [vmem:[#allocation2 + $0x88] sm:$0xff] %v889_v53  ;;  %v777_v59 = vpop.f32.mrb[18].mxu0  ;;  %965 = vst [vmem:[#allocation2 + $0x158] sm:$0xff] %v915_v55  ;;  %v855_v60 = vpop.f32.mrb[18].mxu1  ;;  %vm1040_vm13 = vcmp.ge.f32.partialorder (!%p1500_p7), %v989_v46, 0.0  ;;  %v1078_v52 = vmul.f32 (!%p1500_p7), %v2366_v51, %v976_v33  ;;  %v1079_v53 = vmul.f32 (!%p1500_p7), %v2366_v51, %v977_v34  ;;  %v1081_v55 = vmul.f32 (!%p1500_p7), %v2366_v51, %v979_v36 }
 0x1f9   : > { %v890_v61 = vadd.f32 %v777_v59, %v511_v54  ;;  %v779_v62 = vpop.f32.mrb[19].mxu0  ;;  %v916_v63 = vadd.f32 %v855_v60, %v537_v56  ;;  %v857_v0 = vpop.f32.mrb[19].mxu1  ;;  %v1080_v54 = vmul.f32 (!%p1500_p7), %v2366_v51, %v978_v35  ;;  %v1082_v56 = vmul.f32 (!%p1500_p7), %v2366_v51, %v980_v37 }
 0x1fa   : > { %v891_v1 = vadd.f32 %v779_v62, %v512_v57  ;;  %v917_v3 = vadd.f32 %v857_v0, %v538_v58  ;;  %v990_v47 = vld [vmem:[#allocation2 + $0x70] sm:$0xff] (!%p1500_p7)  ;;  %v1083_v57 = vmul.f32 (!%p1500_p7), %v2366_v51, %v981_v38  ;;  %v1084_v58 = vmul.f32 (!%p1500_p7), %v2366_v51, %v982_v39 }
 0x1fb   : > { %940 = vst [vmem:[#allocation2 + $0x90] sm:$0xff] %v890_v61  ;;  %966 = vst [vmem:[#allocation2 + $0x160] sm:$0xff] %v916_v63  ;;  %vm1041_vm14 = vcmp.ge.f32.partialorder (!%p1500_p7), %v990_v47, 0.0  ;;  %v991_v48 = vld [vmem:[#allocation2 + $0x78] sm:$0xff] (!%p1500_p7)  ;;  %v1085_v59 = vmul.f32 (!%p1500_p7), %v2366_v51, %v983_v40  ;;  %v1128_v60 = vsel (!%p1500_p7), %vm1027_vm0, %v976_v33, %v1078_v52  ;;  %v1129_v61 = vsel (!%p1500_p7), %vm1028_vm1, %v977_v34, %v1079_v53  ;;  %v1006_v52 = vld [vmem:[#allocation2 + $0xf0] sm:$0xff] (!%p1500_p7) }
 0x1fc   : > { %941 = vst [vmem:[#allocation2 + $0x98] sm:$0xff] %v891_v1  ;;  %v783_v7 = vpop.f32.mrb[20].mxu0  ;;  %967 = vst [vmem:[#allocation2 + $0x168] sm:$0xff] %v917_v3  ;;  %v861_v8 = vpop.f32.mrb[20].mxu1  ;;  %vm1042_vm15 = vcmp.ge.f32.partialorder (!%p1500_p7), %v991_v48, 0.0  ;;  %v1130_v62 = vsel (!%p1500_p7), %vm1029_vm2, %v978_v35, %v1080_v54  ;;  %v1131_v63 = vsel (!%p1500_p7), %vm1030_vm3, %v979_v36, %v1081_v55  ;;  %v1132_v0 = vsel (!%p1500_p7), %vm1031_vm4, %v980_v37, %v1082_v56  ;;  %v1007_v56 = vld [vmem:[#allocation2 + $0xf8] sm:$0xff] (!%p1500_p7) }
 0x1fd   : > { %v892_v9 = vadd.f32 %v783_v7, %v513_v2  ;;  %v785_v10 = vpop.f32.mrb[21].mxu0  ;;  %v918_v11 = vadd.f32 %v861_v8, %v539_v4  ;;  %v863_v12 = vpop.f32.mrb[21].mxu1  ;;  %1178 = vst [vmem:[%s2241_s5] sm:$0xff] (!%p1500_p7), %v1128_v60  ;;  %1179 = vst [vmem:[%s2241_s5 + $0x8] sm:$0xff] (!%p1500_p7), %v1129_v61  ;;  %v1133_v1 = vsel (!%p1500_p7), %vm1032_vm5, %v981_v38, %v1083_v57  ;;  %vm2690_vm0 = vcmp.ge.f32.partialorder (!%p1500_p7), %v985_v42, 0.0  ;;  %v1008_v57 = vld [vmem:[#allocation2 + $0x100] sm:$0xff] (!%p1500_p7)  ;;  %v1009_v60 = vld [vmem:[#allocation2 + $0x108] sm:$0xff] (!%p1500_p7) }
 0x1fe   : > { %v893_v13 = vadd.f32 %v785_v10, %v514_v5  ;;  %v919_v15 = vadd.f32 %v863_v12, %v540_v6  ;;  %v2361_v49 = vld [vmem:[#allocation2 + $0x80] sm:$0xff] (!%p1500_p7)  ;;  %1180 = vst [vmem:[%s2241_s5 + $0x10] sm:$0xff] (!%p1500_p7), %v1130_v62  ;;  %1181 = vst [vmem:[%s2241_s5 + $0x18] sm:$0xff] (!%p1500_p7), %v1131_v63  ;;  %v1134_v2 = vsel (!%p1500_p7), %vm1033_vm6, %v982_v39, %v1084_v58  ;;  %vm2691_vm1 = vcmp.ge.f32.partialorder (!%p1500_p7), %v987_v44, 0.0  ;;  %v1002_v39 = vld [vmem:[#allocation2 + $0xd0] sm:$0xff] (!%p1500_p7) }
 0x1ff   : > { %942 = vst [vmem:[#allocation2 + $0xa0] sm:$0xff] %v892_v9  ;;  %968 = vst [vmem:[#allocation2 + $0x170] sm:$0xff] %v918_v11  ;;  %v2363_v50 = vld [vmem:[#allocation2 + $0x88] sm:$0xff] (!%p1500_p7)  ;;  %vm1043_vm9 = vcmp.ge.f32.partialorder (!%p1500_p7), %v2361_v49, 0.0  ;;  %v1135_v3 = vsel (!%p1500_p7), %vm1034_vm7, %v983_v40, %v1085_v59  ;;  %v1086_v4 = vmul.f32 (!%p1500_p7), %v2366_v51, %v984_v41  ;;  %v1087_v5 = vmul.f32 (!%p1500_p7), %v2366_v51, %v985_v42 }
 0x200   : > { %943 = vst [vmem:[#allocation2 + $0xa8] sm:$0xff] %v893_v13  ;;  %v789_v19 = vpop.f32.mrb[22].mxu0  ;;  %969 = vst [vmem:[#allocation2 + $0x178] sm:$0xff] %v919_v15  ;;  %v867_v20 = vpop.f32.mrb[22].mxu1  ;;  %vm1044_vm11 = vcmp.ge.f32.partialorder (!%p1500_p7), %v2363_v50, 0.0  ;;  %v1088_v6 = vmul.f32 (!%p1500_p7), %v2366_v51, %v986_v43  ;;  %v1089_v7 = vmul.f32 (!%p1500_p7), %v2366_v51, %v987_v44  ;;  %v1090_v8 = vmul.f32 (!%p1500_p7), %v2366_v51, %v988_v45 }
 0x201   : > { %v894_v21 = vadd.f32 %v789_v19, %v515_v14  ;;  %v791_v22 = vpop.f32.mrb[23].mxu0  ;;  %v920_v23 = vadd.f32 %v867_v20, %v541_v16  ;;  %v869_v24 = vpop.f32.mrb[23].mxu1  ;;  %1182 = vst [vmem:[%s2241_s5 + $0x20] sm:$0xff] (!%p1500_p7), %v1132_v0  ;;  %1183 = vst [vmem:[%s2241_s5 + $0x28] sm:$0xff] (!%p1500_p7), %v1133_v1  ;;  %v1091_v9 = vmul.f32 (!%p1500_p7), %v2366_v51, %v989_v46  ;;  %v1010_v0 = vld [vmem:[#allocation2 + $0x110] sm:$0xff] (!%p1500_p7) }
 0x202   : > { %v895_v25 = vadd.f32 %v791_v22, %v516_v17  ;;  %v921_v27 = vadd.f32 %v869_v24, %v542_v18  ;;  %975 = sbr.rel (%p1500_p7) target bundleno = 545 (0x221), region = 75  ;;  %1184 = vst [vmem:[%s2241_s5 + $0x30] sm:$0xff] (!%p1500_p7), %v1134_v2  ;;  %1185 = vst [vmem:[%s2241_s5 + $0x38] sm:$0xff] (!%p1500_p7), %v1135_v3  ;;  %v1092_v10 = vmul.f32 (!%p1500_p7), %v2366_v51, %v990_v47  ;;  %v994_v12 = vld [vmem:[#allocation2 + $0x90] sm:$0xff] (!%p1500_p7)  ;;  %v1011_v3 = vld [vmem:[#allocation2 + $0x118] sm:$0xff] (!%p1500_p7) }
 0x203   : > { %944 = vst [vmem:[#allocation2 + $0xb0] sm:$0xff] %v894_v21  ;;  %970 = vst [vmem:[#allocation2 + $0x180] sm:$0xff] %v920_v23  ;;  %v1093_v11 = vmul.f32 (!%p1500_p7), %v2366_v51, %v991_v48  ;;  %v1136_v13 = vsel (!%p1500_p7), %vm1035_vm8, %v984_v41, %v1086_v4  ;;  %v1137_v14 = vsel (!%p1500_p7), %vm2690_vm0, %v985_v42, %v1087_v5  ;;  %v995_v17 = vld [vmem:[#allocation2 + $0x98] sm:$0xff] (!%p1500_p7)  ;;  %vm1045_vm2 = vcmp.ge.f32.partialorder (!%p1500_p7), %v994_v12, 0.0  ;;  %v1012_v4 = vld [vmem:[#allocation2 + $0x120] sm:$0xff] (!%p1500_p7) }
 0x204   : > { %945 = vst [vmem:[#allocation2 + $0xb8] sm:$0xff] %v895_v25  ;;  %v795_v29 = vpop.f32.mrb[24].mxu0  ;;  %971 = vst [vmem:[#allocation2 + $0x188] sm:$0xff] %v921_v27  ;;  %v1138_v15 = vsel (!%p1500_p7), %vm1037_vm10, %v986_v43, %v1088_v6  ;;  %v1139_v16 = vsel (!%p1500_p7), %vm2691_vm1, %v987_v44, %v1089_v7  ;;  %v1140_v19 = vsel (!%p1500_p7), %vm1039_vm12, %v988_v45, %v1090_v8  ;;  %vm1046_vm3 = vcmp.ge.f32.partialorder (!%p1500_p7), %v995_v17, 0.0  ;;  %v1003_v42 = vld [vmem:[#allocation2 + $0xd8] sm:$0xff] (!%p1500_p7)  ;;  %v1013_v8 = vld [vmem:[#allocation2 + $0x128] sm:$0xff] (!%p1500_p7) }
 0x205   : > { %v896_v30 = vadd.f32 %v795_v29, %v517_v26  ;;  %v797_v31 = vpop.f32.mrb[25].mxu0  ;;  %1186 = vst [vmem:[%s2241_s5 + $0x40] sm:$0xff] (!%p1500_p7), %v1136_v13  ;;  %1187 = vst [vmem:[%s2241_s5 + $0x48] sm:$0xff] (!%p1500_p7), %v1137_v14  ;;  %v1141_v20 = vsel (!%p1500_p7), %vm1040_vm13, %v989_v46, %v1091_v9  ;;  %v1142_v21 = vsel (!%p1500_p7), %vm1041_vm14, %v990_v47, %v1092_v10  ;;  %v1004_v46 = vld [vmem:[#allocation2 + $0xe0] sm:$0xff] (!%p1500_p7)  ;;  %v1005_v47 = vld [vmem:[#allocation2 + $0xe8] sm:$0xff] (!%p1500_p7)  ;;  %vm1053_vm10 = vcmp.ge.f32.partialorder (!%p1500_p7), %v1002_v39, 0.0 }
 0x206   : > { %v897_v32 = vadd.f32 %v797_v31, %v518_v28  ;;  %v996_v18 = vld [vmem:[#allocation2 + $0xa0] sm:$0xff] (!%p1500_p7)  ;;  %1188 = vst [vmem:[%s2241_s5 + $0x50] sm:$0xff] (!%p1500_p7), %v1138_v15  ;;  %1189 = vst [vmem:[%s2241_s5 + $0x58] sm:$0xff] (!%p1500_p7), %v1139_v16  ;;  %v1143_v22 = vsel (!%p1500_p7), %vm1042_vm15, %v991_v48, %v1093_v11  ;;  %v1094_v24 = vmul.f32 (!%p1500_p7), %v2366_v51, %v2361_v49  ;;  %vm1055_vm12 = vcmp.ge.f32.partialorder (!%p1500_p7), %v1004_v46, 0.0  ;;  %v1015_v15 = vld [vmem:[#allocation2 + $0x138] sm:$0xff] (!%p1500_p7) }
 0x207   : > { %946 = vst [vmem:[#allocation2 + $0xc0] sm:$0xff] %v896_v30  ;;  %v997_v23 = vld [vmem:[#allocation2 + $0xa8] sm:$0xff] (!%p1500_p7)  ;;  %1190 = vst [vmem:[%s2241_s5 + $0x60] sm:$0xff] (!%p1500_p7), %v1140_v19  ;;  %v1095_v25 = vmul.f32 (!%p1500_p7), %v2366_v51, %v2363_v50  ;;  %v1096_v26 = vmul.f32 (!%p1500_p7), %v2366_v51, %v994_v12  ;;  %v1097_v28 = vmul.f32 (!%p1500_p7), %v2366_v51, %v995_v17  ;;  %vm1047_vm4 = vcmp.ge.f32.partialorder (!%p1500_p7), %v996_v18, 0.0  ;;  %v1016_v16 = vld [vmem:[#allocation2 + $0x140] sm:$0xff] (!%p1500_p7) }
 0x208   : > { %947 = vst [vmem:[#allocation2 + $0xc8] sm:$0xff] %v897_v32  ;;  %1191 = vst [vmem:[%s2241_s5 + $0x68] sm:$0xff] (!%p1500_p7), %v1141_v20  ;;  %v1098_v29 = vmul.f32 (!%p1500_p7), %v2366_v51, %v996_v18  ;;  %v1144_v32 = vsel (!%p1500_p7), %vm1043_vm9, %v2361_v49, %v1094_v24  ;;  %vm1048_vm5 = vcmp.ge.f32.partialorder (!%p1500_p7), %v997_v23, 0.0  ;;  %v1099_v38 = vmul.f32 (!%p1500_p7), %v2366_v51, %v997_v23  ;;  %v1017_v20 = vld [vmem:[#allocation2 + $0x148] sm:$0xff] (!%p1500_p7)  ;;  %v1018_v24 = vld [vmem:[#allocation2 + $0x150] sm:$0xff] (!%p1500_p7) }
 0x209   : > { %1192 = vst [vmem:[%s2241_s5 + $0x70] sm:$0xff] %v1142_v21  ;;  %1193 = vst [vmem:[%s2241_s5 + $0x78] sm:$0xff] %v1143_v22  ;;  %v1145_v33 = vsel %vm1044_vm11, %v2363_v50, %v1095_v25  ;;  %v1146_v34 = vsel %vm1045_vm2, %v994_v12, %v1096_v26  ;;  %v1147_v36 = vsel %vm1046_vm3, %v995_v17, %v1097_v28  ;;  %vm1054_vm11 = vcmp.ge.f32.partialorder %v1003_v42, 0.0  ;;  %v1014_v12 = vld [vmem:[#allocation2 + $0x130] sm:$0xff]  ;;  %v1020_v28 = vld [vmem:[#allocation2 + $0x160] sm:$0xff] }
 0x20a   : > { %v998_v27 = vld [vmem:[#allocation2 + $0xb0] sm:$0xff]  ;;  %1194 = vst [vmem:[%s2241_s5 + $0x80] sm:$0xff] %v1144_v32  ;;  %1195 = vst [vmem:[%s2241_s5 + $0x88] sm:$0xff] %v1145_v33  ;;  %v1148_v37 = vsel %vm1047_vm4, %v996_v18, %v1098_v29  ;;  %v1149_v43 = vsel %vm1048_vm5, %v997_v23, %v1099_v38  ;;  %v1104_v50 = vmul.f32 %v2366_v51, %v1002_v39  ;;  %vm1056_vm13 = vcmp.ge.f32.partialorder %v1005_v47, 0.0  ;;  %v1021_v32 = vld [vmem:[#allocation2 + $0x168] sm:$0xff] }
 0x20b   : > { %v999_v30 = vld [vmem:[#allocation2 + $0xb8] sm:$0xff]  ;;  %1196 = vst [vmem:[%s2241_s5 + $0x90] sm:$0xff] %v1146_v34  ;;  %vm1049_vm6 = vcmp.ge.f32.partialorder %v998_v27, 0.0  ;;  %1197 = vst [vmem:[%s2241_s5 + $0x98] sm:$0xff] %v1147_v36  ;;  %v1100_v40 = vmul.f32 %v2366_v51, %v998_v27  ;;  %v1105_v55 = vmul.f32 %v2366_v51, %v1003_v42  ;;  %v1106_v59 = vmul.f32 %v2366_v51, %v1004_v46  ;;  %v1022_v36 = vld [vmem:[#allocation2 + $0x170] sm:$0xff] }
 0x20c   : > { %1198 = vst [vmem:[%s2241_s5 + $0xa0] sm:$0xff] %v1148_v37  ;;  %vm1050_vm7 = vcmp.ge.f32.partialorder %v999_v30, 0.0  ;;  %v1101_v41 = vmul.f32 %v2366_v51, %v999_v30  ;;  %1199 = vst [vmem:[%s2241_s5 + $0xa8] sm:$0xff] %v1149_v43  ;;  %v1154_v58 = vsel %vm1053_vm10, %v1002_v39, %v1104_v50  ;;  %v1107_v62 = vmul.f32 %v2366_v51, %v1005_v47  ;;  %v1023_v39 = vld [vmem:[#allocation2 + $0x178] sm:$0xff] }
 0x20d   : > { %v1150_v48 = vsel %vm1049_vm6, %v998_v27, %v1100_v40  ;;  %1204 = vst [vmem:[%s2241_s5 + $0xd0] sm:$0xff] %v1154_v58  ;;  %v1155_v61 = vsel %vm1054_vm11, %v1003_v42, %v1105_v55  ;;  %vm1057_vm14 = vcmp.ge.f32.partialorder %v1006_v52, 0.0  ;;  %v1108_v63 = vmul.f32 %v2366_v51, %v1006_v52  ;;  %v1019_v27 = vld [vmem:[#allocation2 + $0x158] sm:$0xff]  ;;  %v1024_v40 = vld [vmem:[#allocation2 + $0x180] sm:$0xff] }
 0x20e   : > { %v1000_v31 = vld [vmem:[#allocation2 + $0xc0] sm:$0xff]  ;;  %v1151_v49 = vsel %vm1050_vm7, %v999_v30, %v1101_v41  ;;  %1200 = vst [vmem:[%s2241_s5 + $0xb0] sm:$0xff] %v1150_v48  ;;  %1205 = vst [vmem:[%s2241_s5 + $0xd8] sm:$0xff] %v1155_v61  ;;  %v1156_v1 = vsel %vm1055_vm12, %v1004_v46, %v1106_v59  ;;  %vm1058_vm15 = vcmp.ge.f32.partialorder %v1007_v56, 0.0  ;;  %v1109_v2 = vmul.f32 %v2366_v51, %v1007_v56 }
 0x20f   : > { %v1001_v35 = vld [vmem:[#allocation2 + $0xc8] sm:$0xff]  ;;  %vm1051_vm8 = vcmp.ge.f32.partialorder %v1000_v31, 0.0  ;;  %v1102_v44 = vmul.f32 %v2366_v51, %v1000_v31  ;;  %1201 = vst [vmem:[%s2241_s5 + $0xb8] sm:$0xff] %v1151_v49  ;;  %vm1059_vm0 = vcmp.ge.f32.partialorder %v1008_v57, 0.0  ;;  %1206 = vst [vmem:[%s2241_s5 + $0xe0] sm:$0xff] %v1156_v1  ;;  %v1157_v5 = vsel %vm1056_vm13, %v1005_v47, %v1107_v62 }
 0x210   : > { %vm1052_vm9 = vcmp.ge.f32.partialorder %v1001_v35, 0.0  ;;  %v1103_v45 = vmul.f32 %v2366_v51, %v1001_v35  ;;  %v1158_v6 = vsel %vm1057_vm14, %v1006_v52, %v1108_v63  ;;  %v1110_v7 = vmul.f32 %v2366_v51, %v1008_v57  ;;  %1207 = vst [vmem:[%s2241_s5 + $0xe8] sm:$0xff] %v1157_v5 }
 0x211   : > { %v1152_v53 = vsel %vm1051_vm8, %v1000_v31, %v1102_v44  ;;  %vm1060_vm1 = vcmp.ge.f32.partialorder %v1009_v60, 0.0  ;;  %1208 = vst [vmem:[%s2241_s5 + $0xf0] sm:$0xff] %v1158_v6  ;;  %v1159_v9 = vsel %vm1058_vm15, %v1007_v56, %v1109_v2  ;;  %v1111_v10 = vmul.f32 %v2366_v51, %v1009_v60  ;;  %v1025_v44 = vld [vmem:[#allocation2 + $0x188] sm:$0xff] }
 0x212   : > { %v1153_v54 = vsel %vm1052_vm9, %v1001_v35, %v1103_v45  ;;  %1202 = vst [vmem:[%s2241_s5 + $0xc0] sm:$0xff] %v1152_v53  ;;  %vm1061_vm2 = vcmp.ge.f32.partialorder %v1010_v0, 0.0  ;;  %v1112_v11 = vmul.f32 %v2366_v51, %v1010_v0  ;;  %1209 = vst [vmem:[%s2241_s5 + $0xf8] sm:$0xff] %v1159_v9  ;;  %v1160_v13 = vsel %vm1059_vm0, %v1008_v57, %v1110_v7 }
 0x213   : > { %1203 = vst [vmem:[%s2241_s5 + $0xc8] sm:$0xff] %v1153_v54  ;;  %vm1062_vm3 = vcmp.ge.f32.partialorder %v1011_v3, 0.0  ;;  %v1113_v14 = vmul.f32 %v2366_v51, %v1011_v3  ;;  %vm1063_vm4 = vcmp.ge.f32.partialorder %v1012_v4, 0.0  ;;  %1210 = vst [vmem:[%s2241_s5 + $0x100] sm:$0xff] %v1160_v13  ;;  %v1161_v17 = vsel %vm1060_vm1, %v1009_v60, %v1111_v10 }
 0x214   : > { %v1162_v18 = vsel %vm1061_vm2, %v1010_v0, %v1112_v11  ;;  %v1114_v19 = vmul.f32 %v2366_v51, %v1012_v4  ;;  %vm1064_vm5 = vcmp.ge.f32.partialorder %v1013_v8, 0.0  ;;  %1211 = vst [vmem:[%s2241_s5 + $0x108] sm:$0xff] %v1161_v17  ;;  %v1115_v22 = vmul.f32 %v2366_v51, %v1013_v8 }
 0x215   : > { %1212 = vst [vmem:[%s2241_s5 + $0x110] sm:$0xff] %v1162_v18  ;;  %v1163_v21 = vsel %vm1062_vm3, %v1011_v3, %v1113_v14  ;;  %vm1065_vm6 = vcmp.ge.f32.partialorder %v1014_v12, 0.0  ;;  %v1116_v23 = vmul.f32 %v2366_v51, %v1014_v12  ;;  %vm1066_vm7 = vcmp.ge.f32.partialorder %v1015_v15, 0.0 }
 0x216   : > { %1213 = vst [vmem:[%s2241_s5 + $0x118] sm:$0xff] %v1163_v21  ;;  %v1164_v25 = vsel %vm1063_vm4, %v1012_v4, %v1114_v19  ;;  %v1117_v26 = vmul.f32 %v2366_v51, %v1015_v15  ;;  %vm1067_vm8 = vcmp.ge.f32.partialorder %v1016_v16, 0.0  ;;  %v1165_v29 = vsel %vm1064_vm5, %v1013_v8, %v1115_v22 }
 0x217   : > { %1214 = vst [vmem:[%s2241_s5 + $0x120] sm:$0xff] %v1164_v25  ;;  %v1166_v30 = vsel %vm1065_vm6, %v1014_v12, %v1116_v23  ;;  %v1118_v31 = vmul.f32 %v2366_v51, %v1016_v16  ;;  %vm1068_vm9 = vcmp.ge.f32.partialorder %v1017_v20, 0.0  ;;  %1215 = vst [vmem:[%s2241_s5 + $0x128] sm:$0xff] %v1165_v29  ;;  %v1119_v34 = vmul.f32 %v2366_v51, %v1017_v20 }
 0x218   : > { %1216 = vst [vmem:[%s2241_s5 + $0x130] sm:$0xff] %v1166_v30  ;;  %v1167_v33 = vsel %vm1066_vm7, %v1015_v15, %v1117_v26  ;;  %vm1069_vm10 = vcmp.ge.f32.partialorder %v1018_v24, 0.0  ;;  %v1120_v35 = vmul.f32 %v2366_v51, %v1018_v24  ;;  %vm1070_vm11 = vcmp.ge.f32.partialorder %v1019_v27, 0.0 }
 0x219   : > { %1217 = vst [vmem:[%s2241_s5 + $0x138] sm:$0xff] %v1167_v33  ;;  %v1168_v37 = vsel %vm1067_vm8, %v1016_v16, %v1118_v31  ;;  %v1121_v38 = vmul.f32 %v2366_v51, %v1019_v27  ;;  %vm1071_vm12 = vcmp.ge.f32.partialorder %v1020_v28, 0.0  ;;  %v1169_v41 = vsel %vm1068_vm9, %v1017_v20, %v1119_v34 }
 0x21a   : > { %1218 = vst [vmem:[%s2241_s5 + $0x140] sm:$0xff] %v1168_v37  ;;  %v1170_v42 = vsel %vm1069_vm10, %v1018_v24, %v1120_v35  ;;  %v1122_v43 = vmul.f32 %v2366_v51, %v1020_v28  ;;  %vm1072_vm13 = vcmp.ge.f32.partialorder %v1021_v32, 0.0  ;;  %1219 = vst [vmem:[%s2241_s5 + $0x148] sm:$0xff] %v1169_v41  ;;  %v1123_v46 = vmul.f32 %v2366_v51, %v1021_v32 }
 0x21b   : > { %1220 = vst [vmem:[%s2241_s5 + $0x150] sm:$0xff] %v1170_v42  ;;  %v1171_v45 = vsel %vm1070_vm11, %v1019_v27, %v1121_v38  ;;  %vm1073_vm14 = vcmp.ge.f32.partialorder %v1022_v36, 0.0  ;;  %v1124_v47 = vmul.f32 %v2366_v51, %v1022_v36  ;;  %vm1074_vm15 = vcmp.ge.f32.partialorder %v1023_v39, 0.0 }
 0x21c   : > { %1221 = vst [vmem:[%s2241_s5 + $0x158] sm:$0xff] %v1171_v45  ;;  %v1172_v48 = vsel %vm1071_vm12, %v1020_v28, %v1122_v43  ;;  %v1125_v49 = vmul.f32 %v2366_v51, %v1023_v39  ;;  %vm1075_vm0 = vcmp.ge.f32.partialorder %v1024_v40, 0.0  ;;  %v1173_v50 = vsel %vm1072_vm13, %v1021_v32, %v1123_v46 }
 0x21d   : > { %1222 = vst [vmem:[%s2241_s5 + $0x160] sm:$0xff] %v1172_v48  ;;  %v1174_v52 = vsel %vm1073_vm14, %v1022_v36, %v1124_v47  ;;  %v1126_v53 = vmul.f32 %v2366_v51, %v1024_v40  ;;  %vm1076_vm1 = vcmp.ge.f32.partialorder %v1025_v44, 0.0  ;;  %1223 = vst [vmem:[%s2241_s5 + $0x168] sm:$0xff] %v1173_v50  ;;  %v1127_v55 = vmul.f32 %v2366_v51, %v1025_v44 }
 0x21e   : > { %1224 = vst [vmem:[%s2241_s5 + $0x170] sm:$0xff] %v1174_v52  ;;  %v1175_v54 = vsel %vm1074_vm15, %v1023_v39, %v1125_v49 }
 0x21f   : > { %1225 = vst [vmem:[%s2241_s5 + $0x178] sm:$0xff] %v1175_v54  ;;  %v1176_v56 = vsel %vm1075_vm0, %v1024_v40, %v1126_v53  ;;  %v1177_v57 = vsel %vm1076_vm1, %v1025_v44, %v1127_v55 }
 0x220   : > { %1226 = vst [vmem:[%s2241_s5 + $0x180] sm:$0xff] %v1176_v56  ;;  %1227 = vst [vmem:[%s2241_s5 + $0x188] sm:$0xff] %v1177_v57 }
 0x221 PF: > { %p2692_p2 = scmp.ne.s32.totalorder %s2685_s9, 0 }
 0x222   : > { %s1507_s3 = sshll.u32 (%p2692_p2), %s1873_s25, 4  ;;  %v1253_v51 = vld [vmem:[%s2241_s5] sm:$0xff] (%p2692_p2)  ;;  %v1255_v58 = vld [vmem:[%s2241_s5 + $0x8] sm:$0xff] (%p2692_p2)  ;;  %v1257_v59 = vld [vmem:[%s2241_s5 + $0x10] sm:$0xff] (%p2692_p2) }
 0x223   : > { %1234 = sbr.rel (!%p2692_p2) target bundleno = 573 (0x23d), region = 79  ;;  %s2514_s22 = scalar_lea.vmem (%p2692_p2), %s2662_s4, %s1507_s3  ;;  %v1259_v60 = vld [vmem:[%s2241_s5 + $0x18] sm:$0xff] (%p2692_p2)  ;;  %v1261_v61 = vld [vmem:[%s2241_s5 + $0x20] sm:$0xff] (%p2692_p2)  ;;  %v1263_v62 = vld [vmem:[%s2241_s5 + $0x28] sm:$0xff] (%p2692_p2) }
 0x224   : > { %1254 = vst [vmem:[%s2514_s22] sm:$0xff] (%p2692_p2), %v1253_v51  ;;  %1256 = vst [vmem:[%s2514_s22 + $0x8] sm:$0xff] (%p2692_p2), %v1255_v58  ;;  %v1265_v63 = vld [vmem:[%s2241_s5 + $0x30] sm:$0xff] (%p2692_p2)  ;;  %v1267_v0 = vld [vmem:[%s2241_s5 + $0x38] sm:$0xff] (%p2692_p2) }
 0x225   : > { %1258 = vst [vmem:[%s2514_s22 + $0x30] sm:$0xff] (%p2692_p2), %v1257_v59  ;;  %1260 = vst [vmem:[%s2514_s22 + $0x38] sm:$0xff] (%p2692_p2), %v1259_v60  ;;  %v1269_v1 = vld [vmem:[%s2241_s5 + $0x40] sm:$0xff] (%p2692_p2)  ;;  %v1271_v2 = vld [vmem:[%s2241_s5 + $0x48] sm:$0xff] (%p2692_p2) }
 0x226   : > { %1262 = vst [vmem:[%s2514_s22 + $0x60] sm:$0xff] (%p2692_p2), %v1261_v61  ;;  %1264 = vst [vmem:[%s2514_s22 + $0x68] sm:$0xff] (%p2692_p2), %v1263_v62  ;;  %v1273_v3 = vld [vmem:[%s2241_s5 + $0x50] sm:$0xff] (%p2692_p2)  ;;  %v1275_v4 = vld [vmem:[%s2241_s5 + $0x58] sm:$0xff] (%p2692_p2) }
 0x227   : > { %1266 = vst [vmem:[%s2514_s22 + $0x90] sm:$0xff] (%p2692_p2), %v1265_v63  ;;  %1268 = vst [vmem:[%s2514_s22 + $0x98] sm:$0xff] (%p2692_p2), %v1267_v0  ;;  %v1277_v5 = vld [vmem:[%s2241_s5 + $0x60] sm:$0xff] (%p2692_p2)  ;;  %v1279_v6 = vld [vmem:[%s2241_s5 + $0x68] sm:$0xff] (%p2692_p2) }
 0x228   : > { %1270 = vst [vmem:[%s2514_s22 + $0xc0] sm:$0xff] (%p2692_p2), %v1269_v1  ;;  %1272 = vst [vmem:[%s2514_s22 + $0xc8] sm:$0xff] (%p2692_p2), %v1271_v2  ;;  %v1281_v7 = vld [vmem:[%s2241_s5 + $0x70] sm:$0xff] (%p2692_p2)  ;;  %v1283_v8 = vld [vmem:[%s2241_s5 + $0x78] sm:$0xff] (%p2692_p2) }
 0x229   : > { %1274 = vst [vmem:[%s2514_s22 + $0xf0] sm:$0xff] (%p2692_p2), %v1273_v3  ;;  %1276 = vst [vmem:[%s2514_s22 + $0xf8] sm:$0xff] (%p2692_p2), %v1275_v4  ;;  %v1285_v9 = vld [vmem:[%s2241_s5 + $0x80] sm:$0xff] (%p2692_p2)  ;;  %v1287_v10 = vld [vmem:[%s2241_s5 + $0x88] sm:$0xff] (%p2692_p2) }
 0x22a   : > { %1278 = vst [vmem:[%s2514_s22 + $0x120] sm:$0xff] %v1277_v5  ;;  %1280 = vst [vmem:[%s2514_s22 + $0x128] sm:$0xff] %v1279_v6  ;;  %v1289_v11 = vld [vmem:[%s2241_s5 + $0x90] sm:$0xff]  ;;  %v1291_v12 = vld [vmem:[%s2241_s5 + $0x98] sm:$0xff] }
 0x22b   : > { %1282 = vst [vmem:[%s2514_s22 + $0x150] sm:$0xff] %v1281_v7  ;;  %1284 = vst [vmem:[%s2514_s22 + $0x158] sm:$0xff] %v1283_v8  ;;  %v1293_v13 = vld [vmem:[%s2241_s5 + $0xa0] sm:$0xff]  ;;  %v1295_v14 = vld [vmem:[%s2241_s5 + $0xa8] sm:$0xff] }
 0x22c   : > { %1286 = vst [vmem:[%s2514_s22 + $0x180] sm:$0xff] %v1285_v9  ;;  %1288 = vst [vmem:[%s2514_s22 + $0x188] sm:$0xff] %v1287_v10  ;;  %v1297_v15 = vld [vmem:[%s2241_s5 + $0xb0] sm:$0xff]  ;;  %v1299_v16 = vld [vmem:[%s2241_s5 + $0xb8] sm:$0xff] }
 0x22d   : > { %1290 = vst [vmem:[%s2514_s22 + $0x1b0] sm:$0xff] %v1289_v11  ;;  %1292 = vst [vmem:[%s2514_s22 + $0x1b8] sm:$0xff] %v1291_v12  ;;  %v1301_v17 = vld [vmem:[%s2241_s5 + $0xc0] sm:$0xff]  ;;  %v1303_v18 = vld [vmem:[%s2241_s5 + $0xc8] sm:$0xff] }
 0x22e   : > { %1294 = vst [vmem:[%s2514_s22 + $0x1e0] sm:$0xff] %v1293_v13  ;;  %1296 = vst [vmem:[%s2514_s22 + $0x1e8] sm:$0xff] %v1295_v14  ;;  %v1305_v19 = vld [vmem:[%s2241_s5 + $0xd0] sm:$0xff]  ;;  %v1307_v20 = vld [vmem:[%s2241_s5 + $0xd8] sm:$0xff] }
 0x22f   : > { %1298 = vst [vmem:[%s2514_s22 + $0x210] sm:$0xff] %v1297_v15  ;;  %1300 = vst [vmem:[%s2514_s22 + $0x218] sm:$0xff] %v1299_v16  ;;  %v1309_v21 = vld [vmem:[%s2241_s5 + $0xe0] sm:$0xff]  ;;  %v1311_v22 = vld [vmem:[%s2241_s5 + $0xe8] sm:$0xff] }
 0x230   : > { %1302 = vst [vmem:[%s2514_s22 + $0x240] sm:$0xff] %v1301_v17  ;;  %1304 = vst [vmem:[%s2514_s22 + $0x248] sm:$0xff] %v1303_v18  ;;  %v1313_v23 = vld [vmem:[%s2241_s5 + $0xf0] sm:$0xff]  ;;  %v1315_v24 = vld [vmem:[%s2241_s5 + $0xf8] sm:$0xff] }
 0x231   : > { %1306 = vst [vmem:[%s2514_s22 + $0x270] sm:$0xff] %v1305_v19  ;;  %1308 = vst [vmem:[%s2514_s22 + $0x278] sm:$0xff] %v1307_v20  ;;  %v1317_v25 = vld [vmem:[%s2241_s5 + $0x100] sm:$0xff]  ;;  %v1319_v26 = vld [vmem:[%s2241_s5 + $0x108] sm:$0xff] }
 0x232   : > { %1310 = vst [vmem:[%s2514_s22 + $0x2a0] sm:$0xff] %v1309_v21  ;;  %1312 = vst [vmem:[%s2514_s22 + $0x2a8] sm:$0xff] %v1311_v22  ;;  %v1321_v27 = vld [vmem:[%s2241_s5 + $0x110] sm:$0xff]  ;;  %v1323_v28 = vld [vmem:[%s2241_s5 + $0x118] sm:$0xff] }
 0x233   : > { %1314 = vst [vmem:[%s2514_s22 + $0x2d0] sm:$0xff] %v1313_v23  ;;  %1316 = vst [vmem:[%s2514_s22 + $0x2d8] sm:$0xff] %v1315_v24  ;;  %v1325_v29 = vld [vmem:[%s2241_s5 + $0x120] sm:$0xff]  ;;  %v1327_v30 = vld [vmem:[%s2241_s5 + $0x128] sm:$0xff] }
 0x234   : > { %1318 = vst [vmem:[%s2514_s22 + $0x300] sm:$0xff] %v1317_v25  ;;  %1320 = vst [vmem:[%s2514_s22 + $0x308] sm:$0xff] %v1319_v26  ;;  %v1329_v31 = vld [vmem:[%s2241_s5 + $0x130] sm:$0xff]  ;;  %v1331_v32 = vld [vmem:[%s2241_s5 + $0x138] sm:$0xff] }
 0x235   : > { %1322 = vst [vmem:[%s2514_s22 + $0x330] sm:$0xff] %v1321_v27  ;;  %1324 = vst [vmem:[%s2514_s22 + $0x338] sm:$0xff] %v1323_v28  ;;  %v1333_v33 = vld [vmem:[%s2241_s5 + $0x140] sm:$0xff]  ;;  %v1335_v34 = vld [vmem:[%s2241_s5 + $0x148] sm:$0xff] }
 0x236   : > { %1326 = vst [vmem:[%s2514_s22 + $0x360] sm:$0xff] %v1325_v29  ;;  %1328 = vst [vmem:[%s2514_s22 + $0x368] sm:$0xff] %v1327_v30  ;;  %v1337_v35 = vld [vmem:[%s2241_s5 + $0x150] sm:$0xff]  ;;  %v1339_v36 = vld [vmem:[%s2241_s5 + $0x158] sm:$0xff] }
 0x237   : > { %1330 = vst [vmem:[%s2514_s22 + $0x390] sm:$0xff] %v1329_v31  ;;  %1332 = vst [vmem:[%s2514_s22 + $0x398] sm:$0xff] %v1331_v32  ;;  %v1341_v37 = vld [vmem:[%s2241_s5 + $0x160] sm:$0xff]  ;;  %v1343_v38 = vld [vmem:[%s2241_s5 + $0x168] sm:$0xff] }
 0x238   : > { %1334 = vst [vmem:[%s2514_s22 + $0x3c0] sm:$0xff] %v1333_v33  ;;  %1336 = vst [vmem:[%s2514_s22 + $0x3c8] sm:$0xff] %v1335_v34  ;;  %v1345_v39 = vld [vmem:[%s2241_s5 + $0x170] sm:$0xff]  ;;  %v1347_v40 = vld [vmem:[%s2241_s5 + $0x178] sm:$0xff] }
 0x239   : > { %1338 = vst [vmem:[%s2514_s22 + $0x3f0] sm:$0xff] %v1337_v35  ;;  %1340 = vst [vmem:[%s2514_s22 + $0x3f8] sm:$0xff] %v1339_v36  ;;  %v1349_v41 = vld [vmem:[%s2241_s5 + $0x180] sm:$0xff]  ;;  %v1351_v42 = vld [vmem:[%s2241_s5 + $0x188] sm:$0xff] }
 0x23a   : > { %1342 = vst [vmem:[%s2514_s22 + $0x420] sm:$0xff] %v1341_v37  ;;  %1344 = vst [vmem:[%s2514_s22 + $0x428] sm:$0xff] %v1343_v38 }
 0x23b   : > { %1346 = vst [vmem:[%s2514_s22 + $0x450] sm:$0xff] %v1345_v39  ;;  %1348 = vst [vmem:[%s2514_s22 + $0x458] sm:$0xff] %v1347_v40 }
 0x23c   : > { %1350 = vst [vmem:[%s2514_s22 + $0x480] sm:$0xff] %v1349_v41  ;;  %1352 = vst [vmem:[%s2514_s22 + $0x488] sm:$0xff] %v1351_v42 }
 0x23d PF: > { %s21_s28 = sadd.s32 1, %s1885_s28   ;;  %s2694_s9 = sld [smem:[#allocation19_spill]] }
 0x23e   : > { %p2614_p5 = scmp.ge.s32.totalorder %s21_s28, 11   ;;  %s2695_s29 = sld [smem:[#allocation12_spill]] }
 0x23f   : > { %s2696_s22 = sld [smem:[#allocation18_spill]]  ;;  %s2697_s23 = sld [smem:[#allocation13_spill]] }
 0x240   : > { %s2698_s24 = sld [smem:[#allocation17_spill]]  ;;  %s2699_s3 = sld [smem:[#allocation14_spill]] }
 0x241   : > { %s2700_s26 = sld [smem:[#allocation15_spill]]  ;;  %s2701_s11 = sld [smem:[#allocation16_spill]] }
 0x242   : > { %s2703_s17 = smov %s1841_s18  ;;  %s2704_s18 = smov %s1845_s19 }
 0x243   : > { %s2705_s19 = smov %s2694_s9  ;;  %s2706_s20 = smov %s1853_s21 }
 0x244   : > { %s2707_s21 = smov %s2695_s29  ;;  %s2708_s25 = smov %s1881_s27 }
 0x245   :  { %20 = sbr.rel (!%p2614_p5) target bundleno = 14 (0xe), region = 151 }
 0x247   : > { %s2709_s27 = smov %s2701_s11 }
 0x24c   :  { %1368 = vsyncpa [#allocation6], 1 }
 0x24d   :  { %1370 = vsyncpa [#allocation6 + $0x1], 1 }
 0x24e   :  { %1371 = vsyncpa [#allocation8], 1 }
 0x24f   :  { %1373 = vsyncpa [#allocation8 + $0x1], 1 }

</bundles_post_ra>
